<compile_context>
chip_gen: v6e
topology: v6e:2x2x1
jax: 0.10.0
libtpu: 0.0.40
codegen_flags: <defaults>
</compile_context>

<pallas_src>
import functools

import jax
import jax.numpy as jnp
import numpy as np
from jax.experimental import pallas as pl
from jax.experimental.pallas import tpu as pltpu

EPS = 1e-5


# ----------------------------- shared math helpers -----------------------------
def _rms_norm(x, w, eps):
    ms = jnp.mean(x * x, axis=-1, keepdims=True)
    return x * jax.lax.rsqrt(ms + eps) * w


def _gelu_tanh(x):
    c = np.float32(np.sqrt(2.0 / np.pi))
    return 0.5 * x * (1.0 + jnp.tanh(c * (x + 0.044715 * x * x * x)))


def _rotate_half(t):
    # TODO(synk): when Dh % 128 == 0, replace the concat with pltpu.roll + a
    # sign-folded sin table to use the XLU slot instead of VALU + lane shuffles.
    half = t.shape[-1] // 2
    return jnp.concatenate([-t[..., half:], t[..., :half]], axis=-1)


def _vmem_limit_bytes():
    # Generation-aware VMEM budget: ~3/4 of physical capacity (v5e/v6e 128 MiB,
    # v7x 64 MiB).  Falls back to a conservative 48 MiB if the query fails.
    try:
        cap = int(pltpu.get_tpu_info().vmem_capacity_bytes)
    except Exception:
        cap = 64 * 1024 * 1024
    return max(32 * 1024 * 1024, (cap * 3) // 4)


# --------------------------------- Pallas kernels -------------------------------
def decoder_stack_kernel(x_ref, cos_ref, sin_ref,
                         wqkv_ref, bqkv_ref, wo_ref, bo_ref, n1_ref,
                         gate_ref, up_ref, down_ref, n2_ref,
                         out_ref, *, num_heads, eps, ffn_tile):
    """Full decoder stack.  grid = (batch, layer).

    The (1, S, D) output block is the resident f32 residual stream: it is seeded
    from x on layer 0 and updated in place every layer; Pallas writes it back to
    HBM only once per batch element.
    """
    layer = pl.program_id(1)

    @pl.when(layer == 0)
    def _():
        out_ref[0] = x_ref[0]

    x = out_ref[0]                                   # (S, D) f32 residual stream
    S, D = x.shape
    H = num_heads
    Dh = D // H
    xb = x.astype(jnp.bfloat16)                      # single bf16 cast per step

    cos = cos_ref[0]                                 # (S, Dh) f32
    sin = sin_ref[0]

    # Fused q/k/v projection: one full-width MXU matmul (S, D) x (D, 3D).
    qkv = jnp.dot(xb, wqkv_ref[0], preferred_element_type=jnp.float32) + bqkv_ref[0]

    # Per-head attention (static loop, unrolled at trace time).  Reference applies
    # NO 1/sqrt(Dh) scaling and no mask; its dropout output is discarded (no-op).
    # TODO(synk): for long sequences, tile the KV axis with an online softmax
    # (flash-style) instead of the full (S, S) score matrix.
    head_outs = []
    for h in range(H):
        q = qkv[:, h * Dh:(h + 1) * Dh]
        k = qkv[:, D + h * Dh:D + (h + 1) * Dh]
        v = qkv[:, 2 * D + h * Dh:2 * D + (h + 1) * Dh]
        q = q * cos + _rotate_half(q) * sin
        k = k * cos + _rotate_half(k) * sin
        s = jax.lax.dot_general(q.astype(jnp.bfloat16), k.astype(jnp.bfloat16),
                                (((1,), (1,)), ((), ())),
                                preferred_element_type=jnp.float32)   # (S, S)
        s = s - jnp.max(s, axis=-1, keepdims=True)
        p = jnp.exp(s)
        p = p / jnp.sum(p, axis=-1, keepdims=True)   # exact f32 softmax (was approx)
        head_outs.append(jnp.dot(p.astype(jnp.bfloat16), v.astype(jnp.bfloat16),
                                 preferred_element_type=jnp.float32))  # (S, Dh)

    # Concatenate heads and do ONE full-depth output projection.
    attn = jnp.concatenate(head_outs, axis=-1)       # (S, D) f32
    attn = jnp.dot(attn.astype(jnp.bfloat16), wo_ref[0],
                   preferred_element_type=jnp.float32) + bo_ref[0]

    x1 = attn + _rms_norm(x, n1_ref[0], eps)
    x1b = x1.astype(jnp.bfloat16)

    # Gemma feed-forward, tiled over the intermediate dim so the (S, I) f32
    # intermediates stay bounded.
    # TODO(synk): at production I (e.g. 16384) also stream gate/up/down weight
    # tiles from HBM (grid axis or emit_pipeline) instead of resident full blocks.
    intermediate = gate_ref.shape[-1]
    ff = jnp.zeros((S, D), jnp.float32)
    for i0 in range(0, intermediate, ffn_tile):
        g = _gelu_tanh(jnp.dot(x1b, gate_ref[0, :, i0:i0 + ffn_tile],
                               preferred_element_type=jnp.float32))
        u = jnp.dot(x1b, up_ref[0, :, i0:i0 + ffn_tile],
                    preferred_element_type=jnp.float32)
        ff = ff + jnp.dot((g * u).astype(jnp.bfloat16),
                          down_ref[0, i0:i0 + ffn_tile, :],
                          preferred_element_type=jnp.float32)

    out_ref[0] = ff + _rms_norm(x1, n2_ref[0], eps)


def final_head_kernel(x_ref, nf_ref, wl_ref, bl_ref, out_ref, xn_ref, *, eps):
    """Final RMSNorm + logits.  grid = (batch, vocab_tile).

    The normalized, bf16-cast activations are computed once per batch element
    (vocab tile 0) and cached in VMEM scratch across all vocab tiles.
    """
    @pl.when(pl.program_id(1) == 0)
    def _():
        xn_ref[...] = _rms_norm(x_ref[0], nf_ref[...], eps).astype(jnp.bfloat16)

    out_ref[0] = jnp.dot(xn_ref[...], wl_ref[...],
                         preferred_element_type=jnp.float32) + bl_ref[...]


# --------------------------------- wrappers -------------------------------------
def _pick_ffn_tile(intermediate, max_tile=512):
    if intermediate <= max_tile:
        return intermediate
    t = max_tile - (max_tile % 128)
    while t >= 128:
        if intermediate % t == 0:
            return t
        t -= 128
    return intermediate


def _pick_vocab_tile(V, D, S, vmem_limit):
    # Bound TV so double-buffered bf16 weight tile + f32 out tile fit the budget.
    budget = vmem_limit // 2
    cap = max(128, budget // (4 * D + 8 * S))
    cap = min(cap, 4096)
    if V <= cap:
        return V
    t = cap - (cap % 128)
    while t >= 128:
        if V % t == 0:
            return t
        t -= 128
    return V


def run_decoder_stack(x, cos, sin, sp, num_heads, eps):
    B, S, D = x.shape
    L = sp['wqkv'].shape[0]
    Dh = D // num_heads
    intermediate = sp['gate'].shape[-1]
    ffn_tile = _pick_ffn_tile(intermediate)
    vmem_limit = _vmem_limit_bytes()

    kernel = functools.partial(decoder_stack_kernel, num_heads=num_heads, eps=eps,
                               ffn_tile=ffn_tile)

    in_specs = [
        pl.BlockSpec((1, S, D),       lambda b, l: (b, 0, 0)),   # x (layer-0 seed)
        pl.BlockSpec((1, S, Dh),      lambda b, l: (b, 0, 0)),   # cos
        pl.BlockSpec((1, S, Dh),      lambda b, l: (b, 0, 0)),   # sin
        pl.BlockSpec((1, D, 3 * D),   lambda b, l: (l, 0, 0)),   # fused wqkv (in,out)
        pl.BlockSpec((1, 1, 3 * D),   lambda b, l: (l, 0, 0)),   # fused bqkv
        pl.BlockSpec((1, D, D),       lambda b, l: (l, 0, 0)),   # wo (in,out)
        pl.BlockSpec((1, 1, D),       lambda b, l: (l, 0, 0)),   # bo
        pl.BlockSpec((1, 1, D),       lambda b, l: (l, 0, 0)),   # norm1 weight
        pl.BlockSpec((1, D, intermediate), lambda b, l: (l, 0, 0)),  # gate
        pl.BlockSpec((1, D, intermediate), lambda b, l: (l, 0, 0)),  # up
        pl.BlockSpec((1, intermediate, D), lambda b, l: (l, 0, 0)),  # down
        pl.BlockSpec((1, 1, D),       lambda b, l: (l, 0, 0)),   # norm2 weight
    ]
    return pl.pallas_call(
        kernel,
        out_shape=jax.ShapeDtypeStruct((B, S, D), jnp.float32),
        grid=(B, L),
        in_specs=in_specs,
        out_specs=pl.BlockSpec((1, S, D), lambda b, l: (b, 0, 0)),  # resident residual
        compiler_params=pltpu.CompilerParams(
            dimension_semantics=("parallel", "arbitrary"),
            vmem_limit_bytes=vmem_limit),
    )(x, cos, sin,
      sp['wqkv'], sp['bqkv'], sp['wo'], sp['bo'], sp['n1'],
      sp['gate'], sp['up'], sp['down'], sp['n2'])


def run_final(x, fp, eps):
    B, S, D = x.shape
    V = fp['wl'].shape[1]
    vmem_limit = _vmem_limit_bytes()
    TV = _pick_vocab_tile(V, D, S, vmem_limit)
    kernel = functools.partial(final_head_kernel, eps=eps)
    return pl.pallas_call(
        kernel,
        out_shape=jax.ShapeDtypeStruct((B, S, V), jnp.float32),
        grid=(B, V // TV),
        in_specs=[pl.BlockSpec((1, S, D), lambda b, v: (b, 0, 0)),
                  pl.BlockSpec((1, D),    lambda b, v: (0, 0)),
                  pl.BlockSpec((D, TV),   lambda b, v: (0, v)),
                  pl.BlockSpec((1, TV),   lambda b, v: (0, v))],
        out_specs=pl.BlockSpec((1, S, TV), lambda b, v: (b, 0, v)),
        scratch_shapes=[pltpu.VMEM((S, D), jnp.bfloat16)],
        compiler_params=pltpu.CompilerParams(
            dimension_semantics=("parallel", "arbitrary"),
            vmem_limit_bytes=vmem_limit),
    )(x, fp['nf'], fp['wl'], fp['bl'])


def rotary_cos_sin(position_ids, head_dim):
    # Reproduces RotaryEmbed exactly (incl. the unusual exponent arange(0,Dh,2)/2).
    base = 10000.0
    freqs = 1.0 / jnp.power(base, jnp.arange(0, head_dim, 2, dtype=jnp.float32) / 2.0)
    emb = position_ids[:, :, None].astype(jnp.float32) * freqs[None, None, :]
    emb = jnp.concatenate([emb, emb], axis=-1)              # (B, S, Dh)
    return jnp.cos(emb), jnp.sin(emb)


@functools.partial(jax.jit, static_argnames=("num_heads", "eps"))
def multimodal_transformer(attention_mask, position_ids, x,
                           stack_params, final_params, num_heads, eps=EPS):
    del attention_mask  # the reference forward never applies the mask
    D = x.shape[-1]
    cos, sin = rotary_cos_sin(position_ids, D // num_heads)
    h = run_decoder_stack(x, cos, sin, stack_params, num_heads, eps)
    return run_final(h, final_params, eps)


# ----------------------------- parameter init (deterministic) -------------------
def init_params(key, D, I, V, H, num_layers):
    def dense(k, fan_in, shape):
        return (jax.random.normal(k, shape, jnp.float32)
                / np.float32(np.sqrt(fan_in))).astype(jnp.bfloat16)

    def bias(k, n):
        return jax.random.normal(k, (n,), jnp.float32) * 0.02

    wqkv, bqkv, wo, bo, n1, gate, up, down, n2 = ([] for _ in range(9))
    for l in range(num_layers):
        ks = jax.random.split(jax.random.fold_in(key, l), 12)
        wq, wk, wv = dense(ks[0], D, (D, D)), dense(ks[1], D, (D, D)), dense(ks[2], D, (D, D))
        wqkv.append(jnp.concatenate([wq, wk, wv], axis=1))                # (D, 3D)
        bqkv.append(jnp.concatenate([bias(ks[3], D), bias(ks[4], D),
                                     bias(ks[5], D)]).reshape(1, 3 * D))
        wo.append(dense(ks[6], D, (D, D)))
        bo.append(bias(ks[7], D).reshape(1, D))
        n1.append(jnp.ones((1, D), jnp.float32))
        gate.append(dense(ks[8], D, (D, I)))
        up.append(dense(ks[9], D, (D, I)))
        down.append(dense(ks[10], I, (I, D)))
        n2.append(jnp.ones((1, D), jnp.float32))

    stack = lambda xs: jnp.stack(xs, axis=0)
    sp = dict(wqkv=stack(wqkv), bqkv=stack(bqkv), wo=stack(wo), bo=stack(bo),
              n1=stack(n1), gate=stack(gate), up=stack(up), down=stack(down),
              n2=stack(n2))
    kf = jax.random.split(jax.random.fold_in(key, 10_000), 2)
    fp = dict(nf=jnp.ones((1, D), jnp.float32),
              wl=dense(kf[0], D, (D, V)),
              bl=bias(kf[1], V).reshape(1, V))
    return sp, fp


# ----------------------------- pure-JAX reference (for checking) ----------------
def _bf16_mm(a, w):
    return jnp.einsum('...i,io->...o', a.astype(jnp.bfloat16), w.astype(jnp.bfloat16),
                      preferred_element_type=jnp.float32)


def _ref_layer(x, cos, sin, wqkv, bqkv, wo, bo, n1, gate, up, down, n2, H, eps):
    B, S, D = x.shape
    Dh = D // H
    qkv = _bf16_mm(x, wqkv) + bqkv                              # (B, S, 3D)
    split = lambda t: t.reshape(B, S, H, Dh).transpose(0, 2, 1, 3)
    q, k, v = split(qkv[..., :D]), split(qkv[..., D:2 * D]), split(qkv[..., 2 * D:])
    cb, sb = cos[:, None], sin[:, None]
    q = q * cb + _rotate_half(q) * sb
    k = k * cb + _rotate_half(k) * sb
    s = jnp.einsum('bhsd,bhtd->bhst', q.astype(jnp.bfloat16), k.astype(jnp.bfloat16),
                   preferred_element_type=jnp.float32)
    p = jax.nn.softmax(s, axis=-1)
    o = jnp.einsum('bhst,bhtd->bhsd', p.astype(jnp.bfloat16), v.astype(jnp.bfloat16),
                   preferred_element_type=jnp.float32)
    attn = o.transpose(0, 2, 1, 3).reshape(B, S, D)
    attn = _bf16_mm(attn, wo) + bo
    x1 = attn + _rms_norm(x, n1, eps)
    g = _gelu_tanh(_bf16_mm(x1, gate))
    u = _bf16_mm(x1, up)
    return _bf16_mm(g * u, down) + _rms_norm(x1, n2, eps)


def ref_forward(x, position_ids, sp, fp, num_heads, eps=EPS):
    cos, sin = rotary_cos_sin(position_ids, x.shape[-1] // num_heads)
    L = sp['wqkv'].shape[0]
    for l in range(L):
        x = _ref_layer(x, cos, sin, sp['wqkv'][l], sp['bqkv'][l], sp['wo'][l],
                       sp['bo'][l], sp['n1'][l], sp['gate'][l], sp['up'][l],
                       sp['down'][l], sp['n2'][l], num_heads, eps)
    xn = _rms_norm(x, fp['nf'], eps)
    return _bf16_mm(xn, fp['wl']) + fp['bl']


# ------------------------------------ main ---------------------------------------
if __name__ == "__main__":
    # Small shapes consistent with TextConfigs: D=textEmbeddingChannels=32, 4 heads,
    # intermediate=128, vocab=64, batch=2, seq=8, 2 decoder layers.
    B, S, D, H, I, V, L = 2, 8, 32, 4, 128, 64, 2

    key = jax.random.PRNGKey(0)
    kx, kp = jax.random.split(key)
    x = jax.random.normal(kx, (B, S, D), jnp.float32)           # multiModalToLogits
    position_ids = jnp.tile(jnp.arange(S, dtype=jnp.int32)[None, :], (B, 1))
    attention_mask = jnp.ones((B, S), jnp.float32)              # unused by reference

    stack_params, final_params = init_params(kp, D, I, V, H, L)

    out = multimodal_transformer(attention_mask, position_ids, x,
                                 stack_params, final_params, num_heads=H)
    out = jax.block_until_ready(out)
    assert out.shape == (B, S, V)

    ref = ref_forward(x, position_ids, stack_params, final_params, H)
    np.testing.assert_allclose(np.asarray(out), np.asarray(ref), rtol=1e-2, atol=1e-2)

    print("KERNEL_OK")
</pallas_src>

<mosaic_0001>
module attributes {stable_mosaic.version = 11 : i64} {
  func.func @final_head_kernel(%arg0: i32, %arg1: i32, %arg2: memref<1x8x32xf32, #tpu.memory_space<vmem>>, %arg3: memref<1x32xf32, #tpu.memory_space<vmem>>, %arg4: memref<32x64xbf16, #tpu.memory_space<vmem>>, %arg5: memref<1x64xf32, #tpu.memory_space<vmem>>, %arg6: memref<1x8x64xf32, #tpu.memory_space<vmem>>, %arg7: memref<8x32xbf16, #tpu.memory_space<vmem>>) attributes {dimension_semantics = [#tpu.dimension_semantics<parallel>, #tpu.dimension_semantics<arbitrary>], iteration_bounds = array<i64: 2, 1>, scalar_prefetch = 0 : i64, scratch_operands = 1 : i64, tpu.core_type = #tpu.core_type<tc>, window_params = [{transform_indices = @transform_0, window_bounds = array<i64: 1, 8, 32>}, {pipeline_mode = #tpu.pipeline_mode<synchronous>, transform_indices = @transform_1, window_bounds = array<i64: 1, 32>}, {transform_indices = @transform_2, window_bounds = array<i64: 32, 64>}, {transform_indices = @transform_3, window_bounds = array<i64: 1, 64>}, {transform_indices = @transform_4, window_bounds = array<i64: 1, 8, 64>}]} {
    %c0_i32 = arith.constant 0 : i32
    %0 = arith.cmpi eq, %arg1, %c0_i32 : i32
    %1 = arith.extui %0 : i1 to i32
    %c0_i32_0 = arith.constant 0 : i32
    %2 = arith.cmpi ne, %1, %c0_i32_0 : i32
    scf.if %2 {
      %c0_9 = arith.constant 0 : index
      %c0_10 = arith.constant 0 : index
      %c0_11 = arith.constant 0 : index
      %12 = vector.load %arg2[%c0_9, %c0_10, %c0_11] : memref<1x8x32xf32, #tpu.memory_space<vmem>>, vector<1x8x32xf32>
      %13 = vector.shape_cast %12 : vector<1x8x32xf32> to vector<8x32xf32>
      %c0_12 = arith.constant 0 : index
      %c0_13 = arith.constant 0 : index
      %14 = vector.load %arg3[%c0_12, %c0_13] : memref<1x32xf32, #tpu.memory_space<vmem>>, vector<1x32xf32>
      %15 = arith.mulf %13, %13 : vector<8x32xf32>
      %cst_14 = arith.constant dense<0.000000e+00> : vector<8xf32>
      %16 = vector.multi_reduction <add>, %15, %cst_14 [1] : vector<8x32xf32> to vector<8xf32>
      %17 = vector.shape_cast %16 : vector<8xf32> to vector<8x1xf32>
      %cst_15 = arith.constant 3.200000e+01 : f32
      %18 = vector.broadcast %cst_15 : f32 to vector<8x1xf32>
      %19 = arith.divf %17, %18 : vector<8x1xf32>
      %cst_16 = arith.constant 9.99999974E-6 : f32
      %20 = vector.broadcast %cst_16 : f32 to vector<8x1xf32>
      %21 = arith.addf %19, %20 : vector<8x1xf32>
      %22 = math.rsqrt %21 : vector<8x1xf32>
      %23 = vector.broadcast %22 : vector<8x1xf32> to vector<8x32xf32>
      %24 = arith.mulf %13, %23 : vector<8x32xf32>
      %25 = vector.broadcast %14 : vector<1x32xf32> to vector<8x32xf32>
      %26 = arith.mulf %24, %25 : vector<8x32xf32>
      %27 = arith.truncf %26 : vector<8x32xf32> to vector<8x32xbf16>
      %c0_17 = arith.constant 0 : index
      %c0_18 = arith.constant 0 : index
      %28 = vector.load %arg7[%c0_17, %c0_18] : memref<8x32xbf16, #tpu.memory_space<vmem>>, vector<8x32xbf16>
      tpu.vector_store %arg7[%c0_17, %c0_18], %27 {strides = array<i32>} : memref<8x32xbf16, #tpu.memory_space<vmem>>, vector<8x32xbf16>,
    } else {
    }
    %c0 = arith.constant 0 : index
    %c0_1 = arith.constant 0 : index
    %3 = vector.load %arg7[%c0, %c0_1] : memref<8x32xbf16, #tpu.memory_space<vmem>>, vector<8x32xbf16>
    %c0_2 = arith.constant 0 : index
    %c0_3 = arith.constant 0 : index
    %4 = vector.load %arg4[%c0_2, %c0_3] : memref<32x64xbf16, #tpu.memory_space<vmem>>, vector<32x64xbf16>
    %cst = arith.constant dense<0.000000e+00> : vector<8x64xf32>
    %5 = tpu.matmul %3, %4, %cst {dimension_numbers = #tpu.dot_dimension_numbers<[1], [0], [0], [1], [0, 0, 1, 1], [], []>} : vector<8x32xbf16>, vector<32x64xbf16>, vector<8x64xf32> -> vector<8x64xf32>
    %c0_4 = arith.constant 0 : index
    %c0_5 = arith.constant 0 : index
    %6 = vector.load %arg5[%c0_4, %c0_5] : memref<1x64xf32, #tpu.memory_space<vmem>>, vector<1x64xf32>
    %7 = vector.broadcast %6 : vector<1x64xf32> to vector<8x64xf32>
    %8 = arith.addf %5, %7 : vector<8x64xf32>
    %c0_6 = arith.constant 0 : index
    %c0_7 = arith.constant 0 : index
    %c0_8 = arith.constant 0 : index
    %9 = vector.load %arg6[%c0_6, %c0_7, %c0_8] : memref<1x8x64xf32, #tpu.memory_space<vmem>>, vector<1x8x64xf32>
    %10 = vector.shape_cast %9 : vector<1x8x64xf32> to vector<8x64xf32>
    %11 = vector.shape_cast %8 : vector<8x64xf32> to vector<1x8x64xf32>
    tpu.vector_store %arg6[%c0_6, %c0_7, %c0_8], %11 {strides = array<i32>} : memref<1x8x64xf32, #tpu.memory_space<vmem>>, vector<1x8x64xf32>,
    return
  }
  func.func @transform_0(%arg0: i32, %arg1: i32) -> (i32, i32, i32) {
    %c0_i32 = arith.constant 0 : i32
    %c0_i32_0 = arith.constant 0 : i32
    %c0_i32_1 = arith.constant 0 : i32
    return %arg0, %c0_i32, %c0_i32_0 : i32, i32, i32
  }
  func.func @transform_1(%arg0: i32, %arg1: i32) -> (i32, i32) {
    %c0_i32 = arith.constant 0 : i32
    %c0_i32_0 = arith.constant 0 : i32
    %c0_i32_1 = arith.constant 0 : i32
    return %c0_i32, %c0_i32_0 : i32, i32
  }
  func.func @transform_2(%arg0: i32, %arg1: i32) -> (i32, i32) {
    %c0_i32 = arith.constant 0 : i32
    %c0_i32_0 = arith.constant 0 : i32
    return %c0_i32, %arg1 : i32, i32
  }
  func.func @transform_3(%arg0: i32, %arg1: i32) -> (i32, i32) {
    %c0_i32 = arith.constant 0 : i32
    %c0_i32_0 = arith.constant 0 : i32
    return %c0_i32, %arg1 : i32, i32
  }
  func.func @transform_4(%arg0: i32, %arg1: i32) -> (i32, i32, i32) {
    %c0_i32 = arith.constant 0 : i32
    %c0_i32_0 = arith.constant 0 : i32
    return %arg0, %c0_i32, %arg1 : i32, i32, i32
  }
}

module attributes {stable_mosaic.version = 11 : i64} {
  func.func @decoder_stack_kernel(%arg0: i32, %arg1: i32, %arg2: memref<1x8x32xf32, #tpu.memory_space<vmem>>, %arg3: memref<1x8x8xf32, #tpu.memory_space<vmem>>, %arg4: memref<1x8x8xf32, #tpu.memory_space<vmem>>, %arg5: memref<1x32x96xbf16, #tpu.memory_space<vmem>>, %arg6: memref<1x1x96xf32, #tpu.memory_space<vmem>>, %arg7: memref<1x32x32xbf16, #tpu.memory_space<vmem>>, %arg8: memref<1x1x32xf32, #tpu.memory_space<vmem>>, %arg9: memref<1x1x32xf32, #tpu.memory_space<vmem>>, %arg10: memref<1x32x128xbf16, #tpu.memory_space<vmem>>, %arg11: memref<1x32x128xbf16, #tpu.memory_space<vmem>>, %arg12: memref<1x128x32xbf16, #tpu.memory_space<vmem>>, %arg13: memref<1x1x32xf32, #tpu.memory_space<vmem>>, %arg14: memref<1x8x32xf32, #tpu.memory_space<vmem>>) attributes {dimension_semantics = [#tpu.dimension_semantics<parallel>, #tpu.dimension_semantics<arbitrary>], iteration_bounds = array<i64: 2, 2>, scalar_prefetch = 0 : i64, scratch_operands = 0 : i64, tpu.core_type = #tpu.core_type<tc>, window_params = [{transform_indices = @transform_0, window_bounds = array<i64: 1, 8, 32>}, {transform_indices = @transform_1, window_bounds = array<i64: 1, 8, 8>}, {transform_indices = @transform_2, window_bounds = array<i64: 1, 8, 8>}, {transform_indices = @transform_3, window_bounds = array<i64: 1, 32, 96>}, {transform_indices = @transform_4, window_bounds = array<i64: 1, 1, 96>}, {transform_indices = @transform_5, window_bounds = array<i64: 1, 32, 32>}, {transform_indices = @transform_6, window_bounds = array<i64: 1, 1, 32>}, {transform_indices = @transform_7, window_bounds = array<i64: 1, 1, 32>}, {transform_indices = @transform_8, window_bounds = array<i64: 1, 32, 128>}, {transform_indices = @transform_9, window_bounds = array<i64: 1, 32, 128>}, {transform_indices = @transform_10, window_bounds = array<i64: 1, 128, 32>}, {transform_indices = @transform_11, window_bounds = array<i64: 1, 1, 32>}, {transform_indices = @transform_12, window_bounds = array<i64: 1, 8, 32>}]} {
    %c0_i32 = arith.constant 0 : i32
    %0 = arith.cmpi eq, %arg1, %c0_i32 : i32
    %1 = arith.extui %0 : i1 to i32
    %c0_i32_0 = arith.constant 0 : i32
    %2 = arith.cmpi ne, %1, %c0_i32_0 : i32
    scf.if %2 {
      %c0_78 = arith.constant 0 : index
      %c0_79 = arith.constant 0 : index
      %c0_80 = arith.constant 0 : index
      %222 = vector.load %arg2[%c0_78, %c0_79, %c0_80] : memref<1x8x32xf32, #tpu.memory_space<vmem>>, vector<1x8x32xf32>
      %223 = vector.shape_cast %222 : vector<1x8x32xf32> to vector<8x32xf32>
      %c0_81 = arith.constant 0 : index
      %c0_82 = arith.constant 0 : index
      %c0_83 = arith.constant 0 : index
      %224 = vector.load %arg14[%c0_81, %c0_82, %c0_83] : memref<1x8x32xf32, #tpu.memory_space<vmem>>, vector<1x8x32xf32>
      %225 = vector.shape_cast %224 : vector<1x8x32xf32> to vector<8x32xf32>
      %226 = vector.shape_cast %223 : vector<8x32xf32> to vector<1x8x32xf32>
      tpu.vector_store %arg14[%c0_81, %c0_82, %c0_83], %226 {strides = array<i32>} : memref<1x8x32xf32, #tpu.memory_space<vmem>>, vector<1x8x32xf32>,
    } else {
    }
    %c0 = arith.constant 0 : index
    %c0_1 = arith.constant 0 : index
    %c0_2 = arith.constant 0 : index
    %3 = vector.load %arg14[%c0, %c0_1, %c0_2] : memref<1x8x32xf32, #tpu.memory_space<vmem>>, vector<1x8x32xf32>
    %4 = vector.shape_cast %3 : vector<1x8x32xf32> to vector<8x32xf32>
    %5 = arith.truncf %4 : vector<8x32xf32> to vector<8x32xbf16>
    %c0_3 = arith.constant 0 : index
    %c0_4 = arith.constant 0 : index
    %c0_5 = arith.constant 0 : index
    %6 = vector.load %arg3[%c0_3, %c0_4, %c0_5] : memref<1x8x8xf32, #tpu.memory_space<vmem>>, vector<1x8x8xf32>
    %7 = vector.shape_cast %6 : vector<1x8x8xf32> to vector<8x8xf32>
    %c0_6 = arith.constant 0 : index
    %c0_7 = arith.constant 0 : index
    %c0_8 = arith.constant 0 : index
    %8 = vector.load %arg4[%c0_6, %c0_7, %c0_8] : memref<1x8x8xf32, #tpu.memory_space<vmem>>, vector<1x8x8xf32>
    %9 = vector.shape_cast %8 : vector<1x8x8xf32> to vector<8x8xf32>
    %c0_9 = arith.constant 0 : index
    %c0_10 = arith.constant 0 : index
    %c0_11 = arith.constant 0 : index
    %10 = vector.load %arg5[%c0_9, %c0_10, %c0_11] : memref<1x32x96xbf16, #tpu.memory_space<vmem>>, vector<1x32x96xbf16>
    %11 = vector.shape_cast %10 : vector<1x32x96xbf16> to vector<32x96xbf16>
    %cst = arith.constant dense<0.000000e+00> : vector<8x96xf32>
    %12 = tpu.matmul %5, %11, %cst {dimension_numbers = #tpu.dot_dimension_numbers<[1], [0], [0], [1], [0, 0, 1, 1], [], []>} : vector<8x32xbf16>, vector<32x96xbf16>, vector<8x96xf32> -> vector<8x96xf32>
    %c0_12 = arith.constant 0 : index
    %c0_13 = arith.constant 0 : index
    %c0_14 = arith.constant 0 : index
    %13 = vector.load %arg6[%c0_12, %c0_13, %c0_14] : memref<1x1x96xf32, #tpu.memory_space<vmem>>, vector<1x1x96xf32>
    %14 = vector.shape_cast %13 : vector<1x1x96xf32> to vector<1x96xf32>
    %15 = vector.broadcast %14 : vector<1x96xf32> to vector<8x96xf32>
    %16 = arith.addf %12, %15 : vector<8x96xf32>
    %17 = vector.extract_strided_slice %16 {offsets = [0, 0], sizes = [8, 8], strides = [1, 1]} : vector<8x96xf32> to vector<8x8xf32>
    %18 = vector.extract_strided_slice %16 {offsets = [0, 32], sizes = [8, 8], strides = [1, 1]} : vector<8x96xf32> to vector<8x8xf32>
    %19 = vector.extract_strided_slice %16 {offsets = [0, 64], sizes = [8, 8], strides = [1, 1]} : vector<8x96xf32> to vector<8x8xf32>
    %20 = arith.mulf %17, %7 : vector<8x8xf32>
    %21 = vector.extract_strided_slice %17 {offsets = [0, 4], sizes = [8, 4], strides = [1, 1]} : vector<8x8xf32> to vector<8x4xf32>
    %cst_15 = arith.constant 0.000000e+00 : f32
    %22 = vector.broadcast %cst_15 : f32 to vector<8x4xf32>
    %23 = arith.subf %22, %21 : vector<8x4xf32>
    %24 = vector.extract_strided_slice %17 {offsets = [0, 0], sizes = [8, 4], strides = [1, 1]} : vector<8x8xf32> to vector<8x4xf32>
    %25 = tpu.concatenate %23, %24 in 1 : vector<8x4xf32>, vector<8x4xf32> -> vector<8x8xf32>
    %26 = arith.mulf %25, %9 : vector<8x8xf32>
    %27 = arith.addf %20, %26 : vector<8x8xf32>
    %28 = arith.mulf %18, %7 : vector<8x8xf32>
    %29 = vector.extract_strided_slice %18 {offsets = [0, 4], sizes = [8, 4], strides = [1, 1]} : vector<8x8xf32> to vector<8x4xf32>
    %cst_16 = arith.constant 0.000000e+00 : f32
    %30 = vector.broadcast %cst_16 : f32 to vector<8x4xf32>
    %31 = arith.subf %30, %29 : vector<8x4xf32>
    %32 = vector.extract_strided_slice %18 {offsets = [0, 0], sizes = [8, 4], strides = [1, 1]} : vector<8x8xf32> to vector<8x4xf32>
    %33 = tpu.concatenate %31, %32 in 1 : vector<8x4xf32>, vector<8x4xf32> -> vector<8x8xf32>
    %34 = arith.mulf %33, %9 : vector<8x8xf32>
    %35 = arith.addf %28, %34 : vector<8x8xf32>
    %36 = arith.truncf %27 : vector<8x8xf32> to vector<8x8xbf16>
    %37 = arith.truncf %35 : vector<8x8xf32> to vector<8x8xbf16>
    %cst_17 = arith.constant dense<0.000000e+00> : vector<8x8xf32>
    %38 = tpu.matmul %36, %37, %cst_17 {dimension_numbers = #tpu.dot_dimension_numbers<[1], [1], [0], [0], [0, 0, 1, 0], [], []>} : vector<8x8xbf16>, vector<8x8xbf16>, vector<8x8xf32> -> vector<8x8xf32>
    %cst_18 = arith.constant dense<0xFF800000> : vector<8xf32>
    %39 = vector.multi_reduction <maximumf>, %38, %cst_18 [1] : vector<8x8xf32> to vector<8xf32>
    %40 = vector.shape_cast %39 : vector<8xf32> to vector<8x1xf32>
    %41 = vector.broadcast %40 : vector<8x1xf32> to vector<8x8xf32>
    %42 = arith.subf %38, %41 : vector<8x8xf32>
    %43 = math.exp %42 : vector<8x8xf32>
    %cst_19 = arith.constant dense<0.000000e+00> : vector<8xf32>
    %44 = vector.multi_reduction <add>, %43, %cst_19 [1] : vector<8x8xf32> to vector<8xf32>
    %45 = vector.shape_cast %44 : vector<8xf32> to vector<8x1xf32>
    %46 = vector.broadcast %45 : vector<8x1xf32> to vector<8x8xf32>
    %47 = arith.divf %43, %46 : vector<8x8xf32>
    %48 = arith.truncf %47 : vector<8x8xf32> to vector<8x8xbf16>
    %49 = arith.truncf %19 : vector<8x8xf32> to vector<8x8xbf16>
    %cst_20 = arith.constant dense<0.000000e+00> : vector<8x8xf32>
    %50 = tpu.matmul %48, %49, %cst_20 {dimension_numbers = #tpu.dot_dimension_numbers<[1], [0], [0], [1], [0, 0, 1, 1], [], []>} : vector<8x8xbf16>, vector<8x8xbf16>, vector<8x8xf32> -> vector<8x8xf32>
    %51 = vector.extract_strided_slice %16 {offsets = [0, 8], sizes = [8, 8], strides = [1, 1]} : vector<8x96xf32> to vector<8x8xf32>
    %52 = vector.extract_strided_slice %16 {offsets = [0, 40], sizes = [8, 8], strides = [1, 1]} : vector<8x96xf32> to vector<8x8xf32>
    %53 = vector.extract_strided_slice %16 {offsets = [0, 72], sizes = [8, 8], strides = [1, 1]} : vector<8x96xf32> to vector<8x8xf32>
    %54 = arith.mulf %51, %7 : vector<8x8xf32>
    %55 = vector.extract_strided_slice %51 {offsets = [0, 4], sizes = [8, 4], strides = [1, 1]} : vector<8x8xf32> to vector<8x4xf32>
    %cst_21 = arith.constant 0.000000e+00 : f32
    %56 = vector.broadcast %cst_21 : f32 to vector<8x4xf32>
    %57 = arith.subf %56, %55 : vector<8x4xf32>
    %58 = vector.extract_strided_slice %51 {offsets = [0, 0], sizes = [8, 4], strides = [1, 1]} : vector<8x8xf32> to vector<8x4xf32>
    %59 = tpu.concatenate %57, %58 in 1 : vector<8x4xf32>, vector<8x4xf32> -> vector<8x8xf32>
    %60 = arith.mulf %59, %9 : vector<8x8xf32>
    %61 = arith.addf %54, %60 : vector<8x8xf32>
    %62 = arith.mulf %52, %7 : vector<8x8xf32>
    %63 = vector.extract_strided_slice %52 {offsets = [0, 4], sizes = [8, 4], strides = [1, 1]} : vector<8x8xf32> to vector<8x4xf32>
    %cst_22 = arith.constant 0.000000e+00 : f32
    %64 = vector.broadcast %cst_22 : f32 to vector<8x4xf32>
    %65 = arith.subf %64, %63 : vector<8x4xf32>
    %66 = vector.extract_strided_slice %52 {offsets = [0, 0], sizes = [8, 4], strides = [1, 1]} : vector<8x8xf32> to vector<8x4xf32>
    %67 = tpu.concatenate %65, %66 in 1 : vector<8x4xf32>, vector<8x4xf32> -> vector<8x8xf32>
    %68 = arith.mulf %67, %9 : vector<8x8xf32>
    %69 = arith.addf %62, %68 : vector<8x8xf32>
    %70 = arith.truncf %61 : vector<8x8xf32> to vector<8x8xbf16>
    %71 = arith.truncf %69 : vector<8x8xf32> to vector<8x8xbf16>
    %cst_23 = arith.constant dense<0.000000e+00> : vector<8x8xf32>
    %72 = tpu.matmul %70, %71, %cst_23 {dimension_numbers = #tpu.dot_dimension_numbers<[1], [1], [0], [0], [0, 0, 1, 0], [], []>} : vector<8x8xbf16>, vector<8x8xbf16>, vector<8x8xf32> -> vector<8x8xf32>
    %cst_24 = arith.constant dense<0xFF800000> : vector<8xf32>
    %73 = vector.multi_reduction <maximumf>, %72, %cst_24 [1] : vector<8x8xf32> to vector<8xf32>
    %74 = vector.shape_cast %73 : vector<8xf32> to vector<8x1xf32>
    %75 = vector.broadcast %74 : vector<8x1xf32> to vector<8x8xf32>
    %76 = arith.subf %72, %75 : vector<8x8xf32>
    %77 = math.exp %76 : vector<8x8xf32>
    %cst_25 = arith.constant dense<0.000000e+00> : vector<8xf32>
    %78 = vector.multi_reduction <add>, %77, %cst_25 [1] : vector<8x8xf32> to vector<8xf32>
    %79 = vector.shape_cast %78 : vector<8xf32> to vector<8x1xf32>
    %80 = vector.broadcast %79 : vector<8x1xf32> to vector<8x8xf32>
    %81 = arith.divf %77, %80 : vector<8x8xf32>
    %82 = arith.truncf %81 : vector<8x8xf32> to vector<8x8xbf16>
    %83 = arith.truncf %53 : vector<8x8xf32> to vector<8x8xbf16>
    %cst_26 = arith.constant dense<0.000000e+00> : vector<8x8xf32>
    %84 = tpu.matmul %82, %83, %cst_26 {dimension_numbers = #tpu.dot_dimension_numbers<[1], [0], [0], [1], [0, 0, 1, 1], [], []>} : vector<8x8xbf16>, vector<8x8xbf16>, vector<8x8xf32> -> vector<8x8xf32>
    %85 = vector.extract_strided_slice %16 {offsets = [0, 16], sizes = [8, 8], strides = [1, 1]} : vector<8x96xf32> to vector<8x8xf32>
    %86 = vector.extract_strided_slice %16 {offsets = [0, 48], sizes = [8, 8], strides = [1, 1]} : vector<8x96xf32> to vector<8x8xf32>
    %87 = vector.extract_strided_slice %16 {offsets = [0, 80], sizes = [8, 8], strides = [1, 1]} : vector<8x96xf32> to vector<8x8xf32>
    %88 = arith.mulf %85, %7 : vector<8x8xf32>
    %89 = vector.extract_strided_slice %85 {offsets = [0, 4], sizes = [8, 4], strides = [1, 1]} : vector<8x8xf32> to vector<8x4xf32>
    %cst_27 = arith.constant 0.000000e+00 : f32
    %90 = vector.broadcast %cst_27 : f32 to vector<8x4xf32>
    %91 = arith.subf %90, %89 : vector<8x4xf32>
    %92 = vector.extract_strided_slice %85 {offsets = [0, 0], sizes = [8, 4], strides = [1, 1]} : vector<8x8xf32> to vector<8x4xf32>
    %93 = tpu.concatenate %91, %92 in 1 : vector<8x4xf32>, vector<8x4xf32> -> vector<8x8xf32>
    %94 = arith.mulf %93, %9 : vector<8x8xf32>
    %95 = arith.addf %88, %94 : vector<8x8xf32>
    %96 = arith.mulf %86, %7 : vector<8x8xf32>
    %97 = vector.extract_strided_slice %86 {offsets = [0, 4], sizes = [8, 4], strides = [1, 1]} : vector<8x8xf32> to vector<8x4xf32>
    %cst_28 = arith.constant 0.000000e+00 : f32
    %98 = vector.broadcast %cst_28 : f32 to vector<8x4xf32>
    %99 = arith.subf %98, %97 : vector<8x4xf32>
    %100 = vector.extract_strided_slice %86 {offsets = [0, 0], sizes = [8, 4], strides = [1, 1]} : vector<8x8xf32> to vector<8x4xf32>
    %101 = tpu.concatenate %99, %100 in 1 : vector<8x4xf32>, vector<8x4xf32> -> vector<8x8xf32>
    %102 = arith.mulf %101, %9 : vector<8x8xf32>
    %103 = arith.addf %96, %102 : vector<8x8xf32>
    %104 = arith.truncf %95 : vector<8x8xf32> to vector<8x8xbf16>
    %105 = arith.truncf %103 : vector<8x8xf32> to vector<8x8xbf16>
    %cst_29 = arith.constant dense<0.000000e+00> : vector<8x8xf32>
    %106 = tpu.matmul %104, %105, %cst_29 {dimension_numbers = #tpu.dot_dimension_numbers<[1], [1], [0], [0], [0, 0, 1, 0], [], []>} : vector<8x8xbf16>, vector<8x8xbf16>, vector<8x8xf32> -> vector<8x8xf32>
    %cst_30 = arith.constant dense<0xFF800000> : vector<8xf32>
    %107 = vector.multi_reduction <maximumf>, %106, %cst_30 [1] : vector<8x8xf32> to vector<8xf32>
    %108 = vector.shape_cast %107 : vector<8xf32> to vector<8x1xf32>
    %109 = vector.broadcast %108 : vector<8x1xf32> to vector<8x8xf32>
    %110 = arith.subf %106, %109 : vector<8x8xf32>
    %111 = math.exp %110 : vector<8x8xf32>
    %cst_31 = arith.constant dense<0.000000e+00> : vector<8xf32>
    %112 = vector.multi_reduction <add>, %111, %cst_31 [1] : vector<8x8xf32> to vector<8xf32>
    %113 = vector.shape_cast %112 : vector<8xf32> to vector<8x1xf32>
    %114 = vector.broadcast %113 : vector<8x1xf32> to vector<8x8xf32>
    %115 = arith.divf %111, %114 : vector<8x8xf32>
    %116 = arith.truncf %115 : vector<8x8xf32> to vector<8x8xbf16>
    %117 = arith.truncf %87 : vector<8x8xf32> to vector<8x8xbf16>
    %cst_32 = arith.constant dense<0.000000e+00> : vector<8x8xf32>
    %118 = tpu.matmul %116, %117, %cst_32 {dimension_numbers = #tpu.dot_dimension_numbers<[1], [0], [0], [1], [0, 0, 1, 1], [], []>} : vector<8x8xbf16>, vector<8x8xbf16>, vector<8x8xf32> -> vector<8x8xf32>
    %119 = vector.extract_strided_slice %16 {offsets = [0, 24], sizes = [8, 8], strides = [1, 1]} : vector<8x96xf32> to vector<8x8xf32>
    %120 = vector.extract_strided_slice %16 {offsets = [0, 56], sizes = [8, 8], strides = [1, 1]} : vector<8x96xf32> to vector<8x8xf32>
    %121 = vector.extract_strided_slice %16 {offsets = [0, 88], sizes = [8, 8], strides = [1, 1]} : vector<8x96xf32> to vector<8x8xf32>
    %122 = arith.mulf %119, %7 : vector<8x8xf32>
    %123 = vector.extract_strided_slice %119 {offsets = [0, 4], sizes = [8, 4], strides = [1, 1]} : vector<8x8xf32> to vector<8x4xf32>
    %cst_33 = arith.constant 0.000000e+00 : f32
    %124 = vector.broadcast %cst_33 : f32 to vector<8x4xf32>
    %125 = arith.subf %124, %123 : vector<8x4xf32>
    %126 = vector.extract_strided_slice %119 {offsets = [0, 0], sizes = [8, 4], strides = [1, 1]} : vector<8x8xf32> to vector<8x4xf32>
    %127 = tpu.concatenate %125, %126 in 1 : vector<8x4xf32>, vector<8x4xf32> -> vector<8x8xf32>
    %128 = arith.mulf %127, %9 : vector<8x8xf32>
    %129 = arith.addf %122, %128 : vector<8x8xf32>
    %130 = arith.mulf %120, %7 : vector<8x8xf32>
    %131 = vector.extract_strided_slice %120 {offsets = [0, 4], sizes = [8, 4], strides = [1, 1]} : vector<8x8xf32> to vector<8x4xf32>
    %cst_34 = arith.constant 0.000000e+00 : f32
    %132 = vector.broadcast %cst_34 : f32 to vector<8x4xf32>
    %133 = arith.subf %132, %131 : vector<8x4xf32>
    %134 = vector.extract_strided_slice %120 {offsets = [0, 0], sizes = [8, 4], strides = [1, 1]} : vector<8x8xf32> to vector<8x4xf32>
    %135 = tpu.concatenate %133, %134 in 1 : vector<8x4xf32>, vector<8x4xf32> -> vector<8x8xf32>
    %136 = arith.mulf %135, %9 : vector<8x8xf32>
    %137 = arith.addf %130, %136 : vector<8x8xf32>
    %138 = arith.truncf %129 : vector<8x8xf32> to vector<8x8xbf16>
    %139 = arith.truncf %137 : vector<8x8xf32> to vector<8x8xbf16>
    %cst_35 = arith.constant dense<0.000000e+00> : vector<8x8xf32>
    %140 = tpu.matmul %138, %139, %cst_35 {dimension_numbers = #tpu.dot_dimension_numbers<[1], [1], [0], [0], [0, 0, 1, 0], [], []>} : vector<8x8xbf16>, vector<8x8xbf16>, vector<8x8xf32> -> vector<8x8xf32>
    %cst_36 = arith.constant dense<0xFF800000> : vector<8xf32>
    %141 = vector.multi_reduction <maximumf>, %140, %cst_36 [1] : vector<8x8xf32> to vector<8xf32>
    %142 = vector.shape_cast %141 : vector<8xf32> to vector<8x1xf32>
    %143 = vector.broadcast %142 : vector<8x1xf32> to vector<8x8xf32>
    %144 = arith.subf %140, %143 : vector<8x8xf32>
    %145 = math.exp %144 : vector<8x8xf32>
    %cst_37 = arith.constant dense<0.000000e+00> : vector<8xf32>
    %146 = vector.multi_reduction <add>, %145, %cst_37 [1] : vector<8x8xf32> to vector<8xf32>
    %147 = vector.shape_cast %146 : vector<8xf32> to vector<8x1xf32>
    %148 = vector.broadcast %147 : vector<8x1xf32> to vector<8x8xf32>
    %149 = arith.divf %145, %148 : vector<8x8xf32>
    %150 = arith.truncf %149 : vector<8x8xf32> to vector<8x8xbf16>
    %151 = arith.truncf %121 : vector<8x8xf32> to vector<8x8xbf16>
    %cst_38 = arith.constant dense<0.000000e+00> : vector<8x8xf32>
    %152 = tpu.matmul %150, %151, %cst_38 {dimension_numbers = #tpu.dot_dimension_numbers<[1], [0], [0], [1], [0, 0, 1, 1], [], []>} : vector<8x8xbf16>, vector<8x8xbf16>, vector<8x8xf32> -> vector<8x8xf32>
    %153 = tpu.concatenate %50, %84, %118, %152 in 1 : vector<8x8xf32>, vector<8x8xf32>, vector<8x8xf32>, vector<8x8xf32> -> vector<8x32xf32>
    %154 = arith.truncf %153 : vector<8x32xf32> to vector<8x32xbf16>
    %c0_39 = arith.constant 0 : index
    %c0_40 = arith.constant 0 : index
    %c0_41 = arith.constant 0 : index
    %155 = vector.load %arg7[%c0_39, %c0_40, %c0_41] : memref<1x32x32xbf16, #tpu.memory_space<vmem>>, vector<1x32x32xbf16>
    %156 = vector.shape_cast %155 : vector<1x32x32xbf16> to vector<32x32xbf16>
    %cst_42 = arith.constant dense<0.000000e+00> : vector<8x32xf32>
    %157 = tpu.matmul %154, %156, %cst_42 {dimension_numbers = #tpu.dot_dimension_numbers<[1], [0], [0], [1], [0, 0, 1, 1], [], []>} : vector<8x32xbf16>, vector<32x32xbf16>, vector<8x32xf32> -> vector<8x32xf32>
    %c0_43 = arith.constant 0 : index
    %c0_44 = arith.constant 0 : index
    %c0_45 = arith.constant 0 : index
    %158 = vector.load %arg8[%c0_43, %c0_44, %c0_45] : memref<1x1x32xf32, #tpu.memory_space<vmem>>, vector<1x1x32xf32>
    %159 = vector.shape_cast %158 : vector<1x1x32xf32> to vector<1x32xf32>
    %160 = vector.broadcast %159 : vector<1x32xf32> to vector<8x32xf32>
    %161 = arith.addf %157, %160 : vector<8x32xf32>
    %c0_46 = arith.constant 0 : index
    %c0_47 = arith.constant 0 : index
    %c0_48 = arith.constant 0 : index
    %162 = vector.load %arg9[%c0_46, %c0_47, %c0_48] : memref<1x1x32xf32, #tpu.memory_space<vmem>>, vector<1x1x32xf32>
    %163 = vector.shape_cast %162 : vector<1x1x32xf32> to vector<1x32xf32>
    %164 = arith.mulf %4, %4 : vector<8x32xf32>
    %cst_49 = arith.constant dense<0.000000e+00> : vector<8xf32>
    %165 = vector.multi_reduction <add>, %164, %cst_49 [1] : vector<8x32xf32> to vector<8xf32>
    %166 = vector.shape_cast %165 : vector<8xf32> to vector<8x1xf32>
    %cst_50 = arith.constant 3.200000e+01 : f32
    %167 = vector.broadcast %cst_50 : f32 to vector<8x1xf32>
    %168 = arith.divf %166, %167 : vector<8x1xf32>
    %cst_51 = arith.constant 9.99999974E-6 : f32
    %169 = vector.broadcast %cst_51 : f32 to vector<8x1xf32>
    %170 = arith.addf %168, %169 : vector<8x1xf32>
    %171 = math.rsqrt %170 : vector<8x1xf32>
    %172 = vector.broadcast %171 : vector<8x1xf32> to vector<8x32xf32>
    %173 = arith.mulf %4, %172 : vector<8x32xf32>
    %174 = vector.broadcast %163 : vector<1x32xf32> to vector<8x32xf32>
    %175 = arith.mulf %173, %174 : vector<8x32xf32>
    %176 = arith.addf %161, %175 : vector<8x32xf32>
    %177 = arith.truncf %176 : vector<8x32xf32> to vector<8x32xbf16>
    %cst_52 = arith.constant 0.000000e+00 : f32
    %178 = vector.broadcast %cst_52 : f32 to vector<8x32xf32>
    %c0_53 = arith.constant 0 : index
    %c0_54 = arith.constant 0 : index
    %c0_55 = arith.constant 0 : index
    %179 = vector.load %arg10[%c0_53, %c0_54, %c0_55] : memref<1x32x128xbf16, #tpu.memory_space<vmem>>, vector<1x32x128xbf16>
    %180 = vector.shape_cast %179 : vector<1x32x128xbf16> to vector<32x128xbf16>
    %cst_56 = arith.constant dense<0.000000e+00> : vector<8x128xf32>
    %181 = tpu.matmul %177, %180, %cst_56 {dimension_numbers = #tpu.dot_dimension_numbers<[1], [0], [0], [1], [0, 0, 1, 1], [], []>} : vector<8x32xbf16>, vector<32x128xbf16>, vector<8x128xf32> -> vector<8x128xf32>
    %cst_57 = arith.constant 5.000000e-01 : f32
    %182 = vector.broadcast %cst_57 : f32 to vector<8x128xf32>
    %183 = arith.mulf %182, %181 : vector<8x128xf32>
    %cst_58 = arith.constant 4.471500e-02 : f32
    %184 = vector.broadcast %cst_58 : f32 to vector<8x128xf32>
    %185 = arith.mulf %184, %181 : vector<8x128xf32>
    %186 = arith.mulf %185, %181 : vector<8x128xf32>
    %187 = arith.mulf %186, %181 : vector<8x128xf32>
    %188 = arith.addf %181, %187 : vector<8x128xf32>
    %cst_59 = arith.constant 0.797884583 : f32
    %189 = vector.broadcast %cst_59 : f32 to vector<8x128xf32>
    %190 = arith.mulf %189, %188 : vector<8x128xf32>
    %191 = math.tanh %190 : vector<8x128xf32>
    %cst_60 = arith.constant 1.000000e+00 : f32
    %192 = vector.broadcast %cst_60 : f32 to vector<8x128xf32>
    %193 = arith.addf %192, %191 : vector<8x128xf32>
    %194 = arith.mulf %183, %193 : vector<8x128xf32>
    %c0_61 = arith.constant 0 : index
    %c0_62 = arith.constant 0 : index
    %c0_63 = arith.constant 0 : index
    %195 = vector.load %arg11[%c0_61, %c0_62, %c0_63] : memref<1x32x128xbf16, #tpu.memory_space<vmem>>, vector<1x32x128xbf16>
    %196 = vector.shape_cast %195 : vector<1x32x128xbf16> to vector<32x128xbf16>
    %cst_64 = arith.constant dense<0.000000e+00> : vector<8x128xf32>
    %197 = tpu.matmul %177, %196, %cst_64 {dimension_numbers = #tpu.dot_dimension_numbers<[1], [0], [0], [1], [0, 0, 1, 1], [], []>} : vector<8x32xbf16>, vector<32x128xbf16>, vector<8x128xf32> -> vector<8x128xf32>
    %198 = arith.mulf %194, %197 : vector<8x128xf32>
    %199 = arith.truncf %198 : vector<8x128xf32> to vector<8x128xbf16>
    %c0_65 = arith.constant 0 : index
    %c0_66 = arith.constant 0 : index
    %c0_67 = arith.constant 0 : index
    %200 = vector.load %arg12[%c0_65, %c0_66, %c0_67] : memref<1x128x32xbf16, #tpu.memory_space<vmem>>, vector<1x128x32xbf16>
    %201 = vector.shape_cast %200 : vector<1x128x32xbf16> to vector<128x32xbf16>
    %cst_68 = arith.constant dense<0.000000e+00> : vector<8x32xf32>
    %202 = tpu.matmul %199, %201, %cst_68 {dimension_numbers = #tpu.dot_dimension_numbers<[1], [0], [0], [1], [0, 0, 1, 1], [], []>} : vector<8x128xbf16>, vector<128x32xbf16>, vector<8x32xf32> -> vector<8x32xf32>
    %203 = arith.addf %178, %202 : vector<8x32xf32>
    %c0_69 = arith.constant 0 : index
    %c0_70 = arith.constant 0 : index
    %c0_71 = arith.constant 0 : index
    %204 = vector.load %arg13[%c0_69, %c0_70, %c0_71] : memref<1x1x32xf32, #tpu.memory_space<vmem>>, vector<1x1x32xf32>
    %205 = vector.shape_cast %204 : vector<1x1x32xf32> to vector<1x32xf32>
    %206 = arith.mulf %176, %176 : vector<8x32xf32>
    %cst_72 = arith.constant dense<0.000000e+00> : vector<8xf32>
    %207 = vector.multi_reduction <add>, %206, %cst_72 [1] : vector<8x32xf32> to vector<8xf32>
    %208 = vector.shape_cast %207 : vector<8xf32> to vector<8x1xf32>
    %cst_73 = arith.constant 3.200000e+01 : f32
    %209 = vector.broadcast %cst_73 : f32 to vector<8x1xf32>
    %210 = arith.divf %208, %209 : vector<8x1xf32>
    %cst_74 = arith.constant 9.99999974E-6 : f32
    %211 = vector.broadcast %cst_74 : f32 to vector<8x1xf32>
    %212 = arith.addf %210, %211 : vector<8x1xf32>
    %213 = math.rsqrt %212 : vector<8x1xf32>
    %214 = vector.broadcast %213 : vector<8x1xf32> to vector<8x32xf32>
    %215 = arith.mulf %176, %214 : vector<8x32xf32>
    %216 = vector.broadcast %205 : vector<1x32xf32> to vector<8x32xf32>
    %217 = arith.mulf %215, %216 : vector<8x32xf32>
    %218 = arith.addf %203, %217 : vector<8x32xf32>
    %c0_75 = arith.constant 0 : index
    %c0_76 = arith.constant 0 : index
    %c0_77 = arith.constant 0 : index
    %219 = vector.load %arg14[%c0_75, %c0_76, %c0_77] : memref<1x8x32xf32, #tpu.memory_space<vmem>>, vector<1x8x32xf32>
    %220 = vector.shape_cast %219 : vector<1x8x32xf32> to vector<8x32xf32>
    %221 = vector.shape_cast %218 : vector<8x32xf32> to vector<1x8x32xf32>
    tpu.vector_store %arg14[%c0_75, %c0_76, %c0_77], %221 {strides = array<i32>} : memref<1x8x32xf32, #tpu.memory_space<vmem>>, vector<1x8x32xf32>,
    return
  }
  func.func @transform_0(%arg0: i32, %arg1: i32) -> (i32, i32, i32) {
    %c0_i32 = arith.constant 0 : i32
    %c0_i32_0 = arith.constant 0 : i32
    %c0_i32_1 = arith.constant 0 : i32
    return %arg0, %c0_i32, %c0_i32_0 : i32, i32, i32
  }
  func.func @transform_1(%arg0: i32, %arg1: i32) -> (i32, i32, i32) {
    %c0_i32 = arith.constant 0 : i32
    %c0_i32_0 = arith.constant 0 : i32
    %c0_i32_1 = arith.constant 0 : i32
    return %arg0, %c0_i32, %c0_i32_0 : i32, i32, i32
  }
  func.func @transform_2(%arg0: i32, %arg1: i32) -> (i32, i32, i32) {
    %c0_i32 = arith.constant 0 : i32
    %c0_i32_0 = arith.constant 0 : i32
    %c0_i32_1 = arith.constant 0 : i32
    return %arg0, %c0_i32, %c0_i32_0 : i32, i32, i32
  }
  func.func @transform_3(%arg0: i32, %arg1: i32) -> (i32, i32, i32) {
    %c0_i32 = arith.constant 0 : i32
    %c0_i32_0 = arith.constant 0 : i32
    %c0_i32_1 = arith.constant 0 : i32
    return %arg1, %c0_i32, %c0_i32_0 : i32, i32, i32
  }
  func.func @transform_4(%arg0: i32, %arg1: i32) -> (i32, i32, i32) {
    %c0_i32 = arith.constant 0 : i32
    %c0_i32_0 = arith.constant 0 : i32
    %c0_i32_1 = arith.constant 0 : i32
    return %arg1, %c0_i32, %c0_i32_0 : i32, i32, i32
  }
  func.func @transform_5(%arg0: i32, %arg1: i32) -> (i32, i32, i32) {
    %c0_i32 = arith.constant 0 : i32
    %c0_i32_0 = arith.constant 0 : i32
    %c0_i32_1 = arith.constant 0 : i32
    return %arg1, %c0_i32, %c0_i32_0 : i32, i32, i32
  }
  func.func @transform_6(%arg0: i32, %arg1: i32) -> (i32, i32, i32) {
    %c0_i32 = arith.constant 0 : i32
    %c0_i32_0 = arith.constant 0 : i32
    %c0_i32_1 = arith.constant 0 : i32
    return %arg1, %c0_i32, %c0_i32_0 : i32, i32, i32
  }
  func.func @transform_7(%arg0: i32, %arg1: i32) -> (i32, i32, i32) {
    %c0_i32 = arith.constant 0 : i32
    %c0_i32_0 = arith.constant 0 : i32
    %c0_i32_1 = arith.constant 0 : i32
    return %arg1, %c0_i32, %c0_i32_0 : i32, i32, i32
  }
  func.func @transform_8(%arg0: i32, %arg1: i32) -> (i32, i32, i32) {
    %c0_i32 = arith.constant 0 : i32
    %c0_i32_0 = arith.constant 0 : i32
    %c0_i32_1 = arith.constant 0 : i32
    return %arg1, %c0_i32, %c0_i32_0 : i32, i32, i32
  }
  func.func @transform_9(%arg0: i32, %arg1: i32) -> (i32, i32, i32) {
    %c0_i32 = arith.constant 0 : i32
    %c0_i32_0 = arith.constant 0 : i32
    %c0_i32_1 = arith.constant 0 : i32
    return %arg1, %c0_i32, %c0_i32_0 : i32, i32, i32
  }
  func.func @transform_10(%arg0: i32, %arg1: i32) -> (i32, i32, i32) {
    %c0_i32 = arith.constant 0 : i32
    %c0_i32_0 = arith.constant 0 : i32
    %c0_i32_1 = arith.constant 0 : i32
    return %arg1, %c0_i32, %c0_i32_0 : i32, i32, i32
  }
  func.func @transform_11(%arg0: i32, %arg1: i32) -> (i32, i32, i32) {
    %c0_i32 = arith.constant 0 : i32
    %c0_i32_0 = arith.constant 0 : i32
    %c0_i32_1 = arith.constant 0 : i32
    return %arg1, %c0_i32, %c0_i32_0 : i32, i32, i32
  }
  func.func @transform_12(%arg0: i32, %arg1: i32) -> (i32, i32, i32) {
    %c0_i32 = arith.constant 0 : i32
    %c0_i32_0 = arith.constant 0 : i32
    %c0_i32_1 = arith.constant 0 : i32
    return %arg0, %c0_i32, %c0_i32_0 : i32, i32, i32
  }
}

</mosaic_0001>

<bundles_post_ra>
// kernel: multimodal_transformer.3
= control target key start
LH: loop header
LB: loop body
LE: loop exit
PB: predicated region body
PF: predicated region fallthrough
CT: control target
= control target key end

     0   :  { %9 = vsyncpa [#allocation4], 0  ;;  %s766_s0 = inlined_call_operand.vmem [shape: f32[2,8,32], index: 0, kind: input, shape index: {}]   ;;  %s767_s1 = inlined_call_operand.vmem [shape: f32[1,32], index: 1, kind: input, shape index: {}]   ;;  %s768_s2 = inlined_call_operand.vmem [shape: bf16[32,64], index: 2, kind: input, shape index: {}]   ;;  %s769_s3 = inlined_call_operand.vmem [shape: f32[1,64], index: 3, kind: input, shape index: {}]   ;;  %s770_s4 = inlined_call_operand.hbm [shape: f32[2,8,64], index: 4, kind: output, shape index: {}]  }
   0x1   :  { %11 = vsyncpa [#allocation4 + $0x1], 0  ;;  %s641_s15 = smov 0   ;;  %s643_s16 = smov 0  }
   0x2   :  { %s645_s17 = smov 0   ;;  %s647_s18 = smov 0  }
   0x3   :  { %s649_s19 = smov 0   ;;  %s651_s20 = smov 0  }
   0x4 LB: > { %s445_s21 = sadd.s32 4294967295, %s611_s20   ;;  %s446_s22 = sadd.s32 4294967294, %s611_s20   ;;  %s611_s20 = sphi %s651_s20, %s17_s20   ;;  %s607_s19 = sphi %s649_s19, %s777_s19   ;;  %s603_s18 = sphi %s647_s18, %s776_s18   ;;  %s599_s17 = sphi %s645_s17, %s775_s17   ;;  %s595_s16 = sphi %s643_s16, %s774_s16   ;;  %s591_s15 = sphi %s641_s15, %s773_s15  }
   0x5   : > { %s29_s23 = sadd.s32 1, %s607_s19  ;;  %s137_s24 = sadd.s32 1, %s599_s17 }
   0x6   : > { %p31_p0 = scmp.ge.s32.totalorder %s29_s23, 2  ;;  %p147_p1 = scmp.ne.s32.totalorder %s599_s17, %s595_s16 }
   0x7   : > { %p148_p2 = scmp.eq.s32.totalorder %s445_s21, 1  ;;  %p153_p3 = scmp.ne.s32.totalorder %s595_s16, %s591_s15 }
   0x8   : > { %s779_s23 = smov (%p31_p0, %s29_s23), 0  ;;  %p154_p5 = scmp.eq.s32.totalorder %s446_s22, 1 }
   0x9   : > { %p681_p4 = por %p148_p2, %p147_p1  ;;  %s132_s26 = ssub.s32 %s607_s19, %s779_s23 }
   0xa   : > { %p451_p6 = scmp.ge.s32.totalorder %s611_s20, 1  ;;  %p135_p7 = scmp.eq.s32.totalorder %s132_s26, 0 }
   0xb   : > { %p688_p8 = por %p154_p5, %p153_p3  ;;  %p195_p9 = scmp.lt.s32.totalorder %s611_s20, 3 }
   0xc   : > { %s694_s28 = scalar_select %p135_p7, %s599_s17, %s137_s24  }
   0xd   : > { %p196_p10 = pnand %p451_p6, %p195_p9 }
   0xe   : > { %p227_p11 = scmp.lt.s32.totalorder (!%p196_p10), %s603_s18, 1  ;;  %s224_s14 = sand.u32 (!%p196_p10), 1, %s595_s16  }
   0xf   : > { %199 = sbr.rel (%p196_p10) target bundleno = 407 (0x197), region = 36  ;;  %s452_s21 = sshll.u32 (!%p196_p10), %s224_s14, 3 }
  0x10   : > { %s460_s26 = sshll.u32 (!%p196_p10), %s603_s18, 7  ;;  %s336_s8 = scalar_lea.sflag (!%p196_p10), [#allocation4], %s224_s14 }
  0x11   : > { %s615_s9 = smov (!%p196_p10), [#allocation3]  }
  0x12   : > { %s539_s10 = sshll.u32 (!%p196_p10), %s615_s9, 4  ;;  %s540_s10 = int_to_ptr.vmem [resolvable:$false] %s539_s10 }
  0x13   : > { %s541_s11 = scalar_lea.vmem (!%p196_p10), %s540_s10, 256 }
  0x14   : > { %s228_s29 = scalar_select %p227_p11, %s603_s18, 1  ;;  %vm246_vm0 = vcmask 261120   ;;  %v531_v3 = vld [vmem:[%s768_s2 + $0x8] sm:$0xff]   ;;  %v613_v4 = vmov 0.0   ;;  %v532_v5 = vld [vmem:[%s768_s2] sm:$0xff]   ;;  %vm614_vm1 = vmmov 0  }
  0x15   : > { %466 = vmatprep.subr.bf16.mxu0 %v613_v4  ;;  %470 = vmatprep.mubr.msk.bf16.mxu0 %vm614_vm1, %v613_v4  ;;  %v454_v10 = vld [vmem:[%s767_s1] ss:$0 sm:$0xff]  ;;  %vm263_vm2 = vcmask 257024   ;;  %vm333_vm3 = vcmask 523264  }
  0x16   : > { %s453_s30 = sshll.u32 %s228_s29, 3  ;;  %467 = vmatpush3.bf16.msra.mxu0 %v531_v3  ;;  %v455_v15 = vld [vmem:[%s769_s3] ss:$0 sm:$0xff]  ;;  %s226_s29 = scalar_lea.vmem [#allocation3], %s452_s21 }
  0x17   : > { %s230_s7 = scalar_lea.vmem %s766_s0, %s453_s30  ;;  %468 = vmatprep.subr.bf16.mxu0 %v613_v4  ;;  %s350_s30 = sshll.u32 %s226_s29, 4  ;;  %s722_s30 = int_to_ptr.vmem [resolvable:$true] %s350_s30 }
  0x18   : > { %v243_v0 = vld [vmem:[%s230_s7] sm:$0xff]  ;;  %s720_s7 = scalar_lea.hbm %s770_s4, %s460_s26  ;;  %s535_s18 = scalar_lea.vmem %s722_s30, 128 }
  0x19   : > { %v245_v1 = vmul.f32 %v243_v0, %v243_v0  ;;  %p536_p12 = scmp.ne.s32.totalorder %s722_s30, %s535_s18  ;;  %p542_p1 = scmp.lt.s32.totalorder %s722_s30, %s540_s10 }
  0x1a   : > { %469 = vmatpush3.bf16.msra.mxu0 %v532_v5  ;;  %p543_p2 = scmp.lt.s32.totalorder %s541_s11, %s535_s18 }
  0x1b   : > { %v247_v2 = vsel %vm246_vm0, %v245_v1, 0.0  ;;  %p537_p13 = pnand %p536_p12, %p681_p4 }
  0x1c   : > { %248 = vadd.xlane.f32.xlu0 %v247_v2  ;;  %p544_p3 = por %p543_p2, %p542_p1 }
  0x1d   : > { %p538_p0 = pneg %p537_p13 }
  0x1f   : > { %p545_p5 = pnand %p544_p3, %p538_p0 }
  0xa5   : > { %v249_v6 = vpop.xlane.xlu0 %248 }
  0xa6   : > { %v251_v7 = vmul.f32 0.03125, %v249_v6 }
  0xa8   : > { %v252_v8 = vadd.f32 1e-05, %v251_v7 }
  0xaa   : > { %533 = vrsqrt.f32 %v252_v8 }
  0xb7   : > { %v534_v9 = vpop.eup %533 }
  0xb8   : > { %v254_v11 = vmul.f32 %v534_v9, %v243_v0 }
  0xba   : > { %v261_v12 = vmul.f32 %v454_v10, %v254_v11 }
  0xbc   : > { %v262_v13 = vpack.c.bf16 %v261_v12, %v261_v12 }
  0xbe   : > { %264 = vst.msk [vmem:[#allocation2] sm:$0xf] %vm263_vm2, %v262_v13 }
  0xc5   : > { %v265_v14 = vld [vmem:[#allocation2] sm:$0xf] }
  0xc6   : > { %471 = vmatmul.mubr.msk.bf16.vlgmr.msra.gmra.mxu0 %vm246_vm0, %v265_v14 }
 0x186   : > { %v327_v16 = vpop.f32.mrf.mxu0 }
 0x187   : > { %v328_v17 = vadd.f32 %v455_v15, %v327_v16 }
 0x188   : > { %v472_v18 = vpop.f32.mrf.mxu0 }
 0x189   : > { %334 = vst.msk [vmem:[%s226_s29] sm:$0xff] %vm333_vm3, %v328_v17 }
 0x18a   : > { %v330_v19 = vpop.f32.mrf.mxu0 }
 0x18b   : > { %548 = shalt.err (!%p545_p5)
}
 0x18c   : > { %s549_s12 = scalar_lea.hbm %s720_s7, 128  ;;  %s553_s21 = scalar_lea.hbm %s770_s4, 256 }
 0x18d   : > { %p550_p6 = scmp.ne.s32.totalorder %s720_s7, %s549_s12  ;;  %p554_p10 = scmp.lt.s32.totalorder %s720_s7, %s770_s4 }
 0x18e   : > { %p555_p11 = scmp.lt.s32.totalorder %s553_s21, %s549_s12 }
 0x18f   : > { %p551_p7 = pnand %p550_p6, %p681_p4 }
 0x190   : > { %p556_p12 = por %p555_p11, %p554_p10 }
 0x191   : > { %p552_p9 = pneg %p551_p7 }
 0x193   : > { %p557_p13 = pnand %p556_p12, %p552_p9 }
 0x195   : > { %560 = shalt.err (!%p557_p13)
}
 0x196   : > { %474 = dma.vmem_to_hbm [thread:$0]  (%p681_p4), %s722_s30, 128, %s720_s7, %s336_s8   ;;  %v473_v20 = vpop.f32.mrf.mxu0 }
 0x197 PF: > { %p480_p0 = scmp.ge.s32.totalorder %s611_s20, 2  ;;  %s362_s26 = sand.u32 1, %s591_s15  }
 0x198   : > { %s363_s29 = scalar_lea.sflag [#allocation4], %s362_s26 }
 0x199   : > { %p477_p1 = pnand %p480_p0, %p688_p8 }
 0x19b   : > { %p478_p2 = pneg %p477_p1 }
 0x19d   : > { %586 = dma.done.wait (%p478_p2), %s363_s29, 128  }
 0x19e   : > { %588 = vsyncadd (%p478_p2), %s363_s29, 4294967168  ;;  %s17_s20 = sadd.s32 1, %s611_s20   ;;  %s773_s15 = smov %s595_s16 }
 0x19f   : > { %p14_p3 = scmp.ge.s32.totalorder %s17_s20, 4   ;;  %s774_s16 = smov %s599_s17 }
 0x1a0   : > { %s775_s17 = smov %s694_s28  ;;  %s776_s18 = smov %s607_s19 }
 0x1a1   : > { %s777_s19 = smov %s779_s23  ;;  %16 = sbr.rel (!%p14_p3) target bundleno = 4 (0x4), region = 81 }
 0x1a6   :  { %368 = vsyncpa [#allocation4], 1 }
 0x1a7   :  { %370 = vsyncpa [#allocation4 + $0x1], 1 }

// kernel: multimodal_transformer.2
= control target key start
LH: loop header
LB: loop body
LE: loop exit
PB: predicated region body
PF: predicated region fallthrough
CT: control target
= control target key end

     0   :  { %s2246_s21 = smov 0   ;;  %s2248_s22 = smov 0   ;;  %s2570_s0 = inlined_call_operand.vmem [shape: f32[2,8,32], index: 0, kind: input, shape index: {}]   ;;  %s2571_s1 = inlined_call_operand.vmem [shape: f32[2,8,8], index: 1, kind: input, shape index: {}]   ;;  %s2572_s2 = inlined_call_operand.vmem [shape: f32[2,8,8], index: 2, kind: input, shape index: {}]   ;;  %s2573_s3 = inlined_call_operand.vmem [shape: bf16[2,32,96], index: 3, kind: input, shape index: {}]   ;;  %s2574_s4 = inlined_call_operand.vmem [shape: f32[2,1,96], index: 4, kind: input, shape index: {}]   ;;  %s2575_s5 = inlined_call_operand.vmem [shape: bf16[2,32,32], index: 5, kind: input, shape index: {}]   ;;  %s2576_s6 = inlined_call_operand.vmem [shape: f32[2,1,32], index: 6, kind: input, shape index: {}]   ;;  %s2577_s7 = inlined_call_operand.vmem [shape: f32[2,1,32], index: 7, kind: input, shape index: {}]   ;;  %s2578_s8 = inlined_call_operand.vmem [shape: bf16[2,32,128], index: 8, kind: input, shape index: {}]   ;;  %s2579_s9 = inlined_call_operand.vmem [shape: bf16[2,32,128], index: 9, kind: input, shape index: {}]   ;;  %s2580_s10 = inlined_call_operand.vmem [shape: bf16[2,128,32], index: 10, kind: input, shape index: {}]   ;;  %s2581_s11 = inlined_call_operand.vmem [shape: f32[2,1,32], index: 11, kind: input, shape index: {}]   ;;  %s2582_s12 = inlined_call_operand.vmem [shape: f32[2,8,32], index: 12, kind: output, shape index: {}]  }
   0x1   :  { %2587 = sst [smem:[#allocation8_spill]] %s2570_s0  ;;  %s2250_s23 = smov 0  }
   0x2   :  { %2588 = sst [smem:[#allocation9_spill]] %s2571_s1  ;;  %s2252_s24 = smov 0  }
   0x3   :  { %2589 = sst [smem:[#allocation10_spill]] %s2572_s2  ;;  %s2254_s25 = smov 0  }
   0x4   :  { %2590 = sst [smem:[#allocation11_spill]] %s2573_s3 }
   0x5 LB: > { %2591 = sst [smem:[#allocation2_spill]] %s2137_s21  ;;  %s31_s26 = sadd.s32 1, %s2145_s23  ;;  %s2153_s25 = sphi %s2254_s25, %s22_s25   ;;  %s2149_s24 = sphi %s2252_s24, %s2611_s24   ;;  %s2145_s23 = sphi %s2250_s23, %s2610_s23   ;;  %s2141_s22 = sphi %s2248_s22, %s2609_s22   ;;  %s2137_s21 = sphi %s2246_s21, %s2608_s21  }
   0x6   : > { %2592 = sst [smem:[#allocation3_spill]] %s2145_s23  ;;  %s34_s27 = sadd.s32 1, %s2149_s24 }
   0x7   : > { %2593 = sst [smem:[#allocation4_spill]] %s2149_s24  ;;  %p32_p0 = scmp.ge.s32.totalorder %s31_s26, 2 }
   0x8   : > { %2594 = sst [smem:[#allocation5_spill]] %s2153_s25  ;;  %p1819_p1 = scmp.ge.s32.totalorder %s2153_s25, 1 }
   0x9   : > { %p473_p2 = scmp.lt.s32.totalorder %s2153_s25, 5  ;;  %s2613_s26 = smov (%p32_p0, %s31_s26), 0 }
   0xa   : > { %2595 = sst [smem:[#allocation6_spill]] %s2613_s26  ;;  %s2615_s27 = smov (!%p32_p0, %s34_s27), %s2149_s24 }
   0xb   : > { %p474_p3 = pnand %p1819_p1, %p473_p2  ;;  %p36_p4 = scmp.ge.s32.totalorder %s2615_s27, 2 }
   0xc   : > { %p558_p5 = scmp.lt.s32.totalorder (!%p474_p3), %s2141_s22, 1  ;;  %p570_p6 = scmp.lt.s32.totalorder (!%p474_p3), %s2137_s21, 1 }
   0xd   : > { %s2617_s27 = smov (%p36_p4, %s2615_s27), 0  ;;  %477 = sbr.rel (%p474_p3) target bundleno = 2622 (0xa3e), region = 68 }
   0xe   : > { %2596 = sst [smem:[#allocation7_spill]] %s2617_s27 }
   0xf   : > { %s2597_s0 = sld [smem:[#allocation8_spill]] (!%p474_p3) }
  0x10   : > { %s2598_s1 = sld [smem:[#allocation9_spill]] (!%p474_p3) }
  0x11   : > { %s2600_s3 = sld [smem:[#allocation11_spill]] (!%p474_p3) }
  0x12   : > { %s2619_s22 = smov (!%p558_p5, %s2141_s22), 1  ;;  %s2601_s26 = sld [smem:[#allocation2_spill]] }
  0x13   : > { %s2280_s28 = scalar_select %p570_p6, %s2137_s21, 1 }
  0x14   : > { %s2282_s29 = sshll.u32 %s2619_s22, 3 }
  0x15   : > { %s561_s14 = scalar_lea.vmem %s2597_s0, %s2282_s29  ;;  %s1869_s27 = sshll.u32 %s2280_s28, 4 }
  0x16   : > { %s565_s17 = scalar_lea.vmem %s2598_s1, %s2282_s29  ;;  %s2307_s0 = scalar_lea.vmem %s2575_s5, %s1869_s27 }
  0x17   : > { %s574_s24 = scalar_lea.vmem %s2600_s3, %s1869_s27  ;;  %s2320_s22 = scalar_lea.vmem %s2578_s8, %s1869_s27 }
  0x18   : > { %s2325_s30 = scalar_lea.vmem %s2579_s9, %s1869_s27  ;;  %s1873_s21 = sshll.u32 %s2280_s28, 6 }
  0x19   : > { %s2331_s15 = scalar_lea.vmem %s2580_s10, %s1873_s21  ;;  %s606_s18 = scalar_lea.vmem %s2581_s11, %s2280_s28 }
  0x1a   : > { %s2341_s2 = scalar_lea.vmem %s2582_s12, %s2282_s29  ;;  %p1834_p7 = scmp.ne.s32.totalorder %s2601_s26, 0 }
  0x1c   : > { %615 = sbr.rel (%p1834_p7) target bundleno = 35 (0x23), region = 72 }
  0x21   : > { %v616_v0 = vld [vmem:[%s561_s14] sm:$0xff]  ;;  %vm617_vm0 = vcmask 261120  }
  0x22   : > { %618 = vst.msk [vmem:[%s2341_s2] sm:$0xff] %vm617_vm0, %v616_v0 }
  0x23 PF: > { %v2077_v1 = vld [vmem:[%s574_s24 + $0x8] sm:$0xff]   ;;  %v2155_v2 = vmov 0.0   ;;  %v2078_v3 = vld [vmem:[%s574_s24] sm:$0xff]   ;;  %vm2156_vm1 = vmmov 0   ;;  %vm646_vm2 = vcmask 261120   ;;  %s2157_s1 = smov 32   ;;  %s2602_s27 = scalar_lea.vmem %s2574_s4, %s2280_s28 }
  0x24   : > { %1911 = vmatprep.subr.bf16.mxu1 %v2155_v2  ;;  %1937 = vmatprep.subr.bf16.mxu0 %v2155_v2  ;;  %v2352_v5 = vld [vmem:[%s565_s17] sm:$0xff]  ;;  %s2158_s14 = smov 92   ;;  %s2159_s17 = smov 100   ;;  %vm700_vm3 = vcmask 31744   ;;  %vm727_vm4 = vcmask 64512   ;;  %vm793_vm5 = vcmask 1043456  }
  0x25   : > { %1912 = vmatpush3.bf16.msra.mxu1 %v2077_v1  ;;  %1915 = vmatprep.mubr.msk.bf16.mxu1 %vm2156_vm1, %v2155_v2  ;;  %v1835_v7 = vld [vmem:[%s2602_s27] ss:$0 sm:$0xff]  ;;  %s2603_s25 = sld [smem:[#allocation10_spill]]  ;;  %s2160_s13 = smov 124   ;;  %vm1294_vm6 = vcmask 130048   ;;  %vm1296_vm7 = vcmask 195584  }
  0x26   : > { %1913 = vmatprep.subr.bf16.mxu1 %v2155_v2  ;;  %705 = vrot.lane.b32.xlu1 %v2352_v5, %s2157_s1  ;;  %s2161_s16 = smov 84   ;;  %s2162_s19 = smov 96  }
  0x27   : > { %1939 = vmatprep.mubr.msk.bf16.mxu0 %vm2156_vm1, %v2155_v2  ;;  %s2164_s26 = smov 116   ;;  %s2166_s3 = smov 108  }
  0x28   : > { %s2167_s24 = smov 68   ;;  %s2168_s27 = smov 40  }
  0x29   : > { %v2350_v4 = vld [vmem:[%s2341_s2] sm:$0xff]  ;;  %1914 = vmatpush3.bf16.msra.mxu1 %v2078_v3  ;;  %s2171_s20 = smov 56   ;;  %s2172_s23 = smov 16  }
  0x2a   : > { %v620_v6 = vpack.c.bf16 %v2350_v4, %v2350_v4  ;;  %1919 = vmatprep.subr.bf16.mxu1 %v2155_v2 }
  0x2b   : > { %s2604_s21 = scalar_lea.vmem %s2603_s25, %s2282_s29  ;;  %s2163_s29 = smov 4  }
  0x2c   : > { %1916 = vmatmul.mubr.msk.bf16.vlgmr.msra.gmra.mxu1 %vm646_vm2, %v620_v6  ;;  %v2379_v15 = vld [vmem:[%s2604_s21] sm:$0xff]  ;;  %s2173_s25 = smov 24   ;;  %s2174_s21 = smov 64  }
  0x2d   : > { %1921 = vmatprep.mubr.msk.bf16.mxu1 %vm2156_vm1, %v2155_v2 }
  0x98   : > { %v706_v19 = vpop.permute.xlu1 %705 }
  0xec   : > { %v684_v8 = vpop.f32.mrf.mxu1 }
  0xed   : > { %v2369_v9 = vadd.f32 %v1835_v7, %v684_v8 }
  0xee   : > { %v1917_v10 = vpop.f32.mrf.mxu1 }
  0xef   : > { %v691_v11 = vsub.f32 0.0, %v2369_v9  ;;  %v708_v20 = vmul.f32 %v706_v19, %v2369_v9  ;;  %v690_v29 = vmul.f32 %v2369_v9, %v2352_v5 }
  0xf0   : > { %v687_v12 = vpop.f32.mrf.mxu1 }
  0xf1   : > { %709 = vrot.lane.b32.xlu0 %v691_v11, %s2158_s14 }
  0xf2   : > { %v1918_v13 = vpop.f32.mrf.mxu1 }
  0xf5   : > { %712 = vrot.lane.b32.xlu0 %v2369_v9, %s2159_s17 }
 0x163   : > { %v710_v14 = vpop.permute.xlu0 %709 }
 0x167   : > { %v713_v16 = vpop.permute.xlu0 %712 }
 0x168   : > { %v715_v17 = vsel %vm700_vm3, %v710_v14, %v713_v16 }
 0x169   : > { %v716_v18 = vmul.f32 %v715_v17, %v2379_v15 }
 0x16b   : > { %718 = vrot.lane.b32.xlu1 %v716_v18, %s2157_s1  ;;  %s2165_s1 = smov 76  }
 0x16f   : > { %693 = vrot.lane.b32.xlu1 %v691_v11, %s2160_s13 }
 0x173   : > { %858 = vrot.lane.b32.xlu1 %v691_v11, %s2161_s16 }
 0x1dd   : > { %v719_v21 = vpop.permute.xlu1 %718 }
 0x1de   : > { %v721_v22 = vadd.f32 %v719_v21, %v708_v20 }
 0x1e0   : > { %v723_v23 = vpack.c.bf16 %v721_v22, %v721_v22 }
 0x1e1   : > { %v694_v26 = vpop.permute.xlu1 %693 }
 0x1e2   : > { %725 = vrot.lane.b32.xlu0 %v723_v23, %s2162_s19  ;;  %s2177_s19 = smov 80  }
 0x1e5   : > { %v859_v31 = vpop.permute.xlu1 %858 }
 0x1e6   : > { %697 = vrot.lane.b32.xlu0 %v2369_v9, %s2163_s29  ;;  %s2178_s29 = smov 112  }
 0x1ea   : > { %861 = vrot.lane.b32.xlu0 %v2369_v9, %s2158_s14  ;;  %s2169_s14 = smov 8  }
 0x1ee   : > { %841 = vrot.lane.b32.xlu0 %v691_v11, %s2164_s26 }
 0x1f2   : > { %844 = vrot.lane.b32.xlu0 %v2369_v9, %s2160_s13  ;;  %s2175_s13 = smov 88  }
 0x1f6   : > { %1006 = vrot.lane.b32.xlu0 %v691_v11, %s2165_s1 }
 0x1fa   : > { %1009 = vrot.lane.b32.xlu0 %v2369_v9, %s2161_s16  ;;  %s2176_s16 = smov 120  }
 0x1fe   : > { %989 = vrot.lane.b32.xlu0 %v691_v11, %s2166_s3 }
 0x202   : > { %992 = vrot.lane.b32.xlu0 %v2369_v9, %s2164_s26  ;;  %s2179_s26 = smov 72  }
 0x206   : > { %1154 = vrot.lane.b32.xlu0 %v691_v11, %s2167_s24  ;;  %s2605_s24 = scalar_lea.vmem %s2577_s7, %s2280_s28 }
 0x20a   : > { %1157 = vrot.lane.b32.xlu0 %v2369_v9, %s2165_s1  ;;  %s2180_s1 = smov 104  }
 0x20e   : > { %1137 = vrot.lane.b32.xlu0 %v691_v11, %s2159_s17  ;;  %s2170_s17 = smov 48   ;;  %v2437_v11 = vpack.c.bf16 %v2369_v9, %v2369_v9 }
 0x212   : > { %854 = vrot.lane.b32.xlu0 %v2352_v5, %s2168_s27 }
 0x254   : > { %v726_v24 = vpop.permute.xlu0 %725 }
 0x255   : > { %v732_v25 = vsel %vm727_vm4, %v726_v24, 0 }
 0x256   : > { %1920 = vmatpush3.bf16.xpose.msra.mxu1 %v732_v25 }
 0x257   : > { %1925 = vmatprep.subr.bf16.mxu1 %v2155_v2 }
 0x258   : > { %v698_v27 = vpop.permute.xlu0 %697 }
 0x259   : > { %v701_v28 = vsel %vm700_vm3, %v694_v26, %v698_v27 }
 0x25a   : > { %v702_v30 = vmul.f32 %v701_v28, %v2379_v15 }
 0x25c   : > { %v703_v32 = vadd.f32 %v702_v30, %v690_v29  ;;  %v862_v33 = vpop.permute.xlu0 %861 }
 0x25d   : > { %v864_v34 = vsel %vm700_vm3, %v859_v31, %v862_v33 }
 0x25e   : > { %v722_v35 = vpack.c.bf16 %v703_v32, %v703_v32  ;;  %v865_v36 = vmul.f32 %v864_v34, %v2379_v15 }
 0x260   : > { %v842_v37 = vpop.permute.xlu0 %841  ;;  %867 = vrot.lane.b32.xlu0 %v865_v36, %s2168_s27  ;;  %1922 = vmatmul.mubr.msk.bf16.vlgmr.msra.gmra.mxu1 %vm727_vm4, %v722_v35 }
 0x261   : > { %1927 = vmatprep.mubr.msk.bf16.mxu1 %vm2156_vm1, %v2155_v2 }
 0x264   : > { %v845_v38 = vpop.permute.xlu0 %844  ;;  %837 = vrot.lane.b32.xlu0 %v2352_v5, %s2169_s14 }
 0x265   : > { %v847_v39 = vsel %vm700_vm3, %v842_v37, %v845_v38 }
 0x266   : > { %v848_v56 = vmul.f32 %v847_v39, %v2379_v15 }
 0x268   : > { %v1007_v40 = vpop.permute.xlu0 %1006  ;;  %1002 = vrot.lane.b32.xlu0 %v2352_v5, %s2170_s17 }
 0x26c   : > { %v1010_v41 = vpop.permute.xlu0 %1009 }
 0x26d   : > { %v1012_v42 = vsel %vm700_vm3, %v1007_v40, %v1010_v41 }
 0x26e   : > { %v1013_v43 = vmul.f32 %v1012_v42, %v2379_v15 }
 0x270   : > { %v990_v44 = vpop.permute.xlu0 %989  ;;  %1015 = vrot.lane.b32.xlu0 %v1013_v43, %s2170_s17 }
 0x274   : > { %v993_v45 = vpop.permute.xlu0 %992  ;;  %1150 = vrot.lane.b32.xlu0 %v2352_v5, %s2171_s20 }
 0x275   : > { %v995_v46 = vsel %vm700_vm3, %v990_v44, %v993_v45 }
 0x276   : > { %v996_v57 = vmul.f32 %v995_v46, %v2379_v15 }
 0x278   : > { %v1155_v47 = vpop.permute.xlu0 %1154 }
 0x27c   : > { %v1158_v48 = vpop.permute.xlu0 %1157 }
 0x27d   : > { %v1160_v49 = vsel %vm700_vm3, %v1155_v47, %v1158_v48 }
 0x27e   : > { %v1161_v50 = vmul.f32 %v1160_v49, %v2379_v15 }
 0x280   : > { %1163 = vrot.lane.b32.xlu0 %v1161_v50, %s2171_s20  ;;  %v1138_v58 = vpop.permute.xlu0 %1137 }
 0x284   : > { %v855_v59 = vpop.permute.xlu0 %854 }
 0x285   : > { %v857_v7 = vmul.f32 %v855_v59, %v2369_v9 }
 0x2d2   : > { %v868_v60 = vpop.permute.xlu0 %867 }
 0x2d6   : > { %v838_v63 = vpop.permute.xlu0 %837 }
 0x2d7   : > { %v840_v12 = vmul.f32 %v838_v63, %v2369_v9 }
 0x2da   : > { %v1003_v10 = vpop.permute.xlu0 %1002 }
 0x2db   : > { %v1005_v17 = vmul.f32 %v1003_v10, %v2369_v9 }
 0x2e2   : > { %v1016_v13 = vpop.permute.xlu0 %1015 }
 0x2e3   : > { %v1018_v19 = vadd.f32 %v1016_v13, %v1005_v17 }
 0x2e5   : > { %v1020_v25 = vpack.c.bf16 %v1018_v19, %v1018_v19 }
 0x2e6   : > { %v1151_v21 = vpop.permute.xlu0 %1150 }
 0x2e7   : > { %v1153_v28 = vmul.f32 %v1151_v21, %v2369_v9 }
 0x2f2   : > { %v1164_v27 = vpop.permute.xlu0 %1163 }
 0x2f3   : > { %v1166_v29 = vadd.f32 %v1164_v27, %v1153_v28 }
 0x2f5   : > { %v1168_v31 = vpack.c.bf16 %v1166_v29, %v1166_v29 }
 0x320   : > { %v768_v51 = vpop.f32.mrf.mxu1 }
 0x321   : > { %v774_v52 = vsel %vm727_vm4, %v768_v51, -inf }
 0x322   : > { %775 = vmax.xlane.f32.xlu1 %v774_v52  ;;  %v1923_v53 = vpop.f32.mrf.mxu1 }
 0x324   : > { %v771_v54 = vpop.f32.mrf.mxu1 }
 0x326   : > { %v1924_v55 = vpop.f32.mrf.mxu1 }
 0x333   : > { %1140 = vrot.lane.b32.xlu1 %v2369_v9, %s2166_s3 }
 0x337   : > { %850 = vrot.lane.b32.xlu1 %v848_v56, %s2169_s14 }
 0x33b   : > { %985 = vrot.lane.b32.xlu1 %v2352_v5, %s2172_s23 }
 0x33f   : > { %998 = vrot.lane.b32.xlu1 %v996_v57, %s2172_s23 }
 0x343   : > { %1133 = vrot.lane.b32.xlu1 %v2352_v5, %s2173_s25  ;;  %v870_v5 = vadd.f32 %v868_v60, %v857_v7 }
 0x345   : > { %v872_v16 = vpack.c.bf16 %v870_v5, %v870_v5 }
 0x3ab   : > { %v776_v61 = vpop.xlane.xlu1 %775 }
 0x3ac   : > { %v777_v62 = vsub.f32 %v768_v51, %v776_v61 }
 0x3ae   : > { %v778_v0 = vmul.f32 1.442695, %v777_v62 }
 0x3af   : > { %v1141_v1 = vpop.permute.xlu1 %1140 }
 0x3b0   : > { %2093 = vpow2.f32 %v778_v0  ;;  %v1143_v3 = vsel %vm700_vm3, %v1138_v58, %v1141_v1 }
 0x3b1   : > { %v1144_v6 = vmul.f32 %v1143_v3, %v2379_v15 }
 0x3b3   : > { %1146 = vrot.lane.b32.xlu0 %v1144_v6, %s2173_s25  ;;  %v851_v8 = vpop.permute.xlu1 %850 }
 0x3b4   : > { %v853_v15 = vadd.f32 %v851_v8, %v840_v12 }
 0x3b6   : > { %v871_v20 = vpack.c.bf16 %v853_v15, %v853_v15 }
 0x3b7   : > { %788 = vrot.lane.b32.xlu0 %v2437_v11, %s2174_s21  ;;  %v986_v14 = vpop.permute.xlu1 %985 }
 0x3b8   : > { %v988_v24 = vmul.f32 %v986_v14, %v2369_v9 }
 0x3bb   : > { %877 = vrot.lane.b32.xlu0 %v872_v16, %s2175_s13  ;;  %v999_v22 = vpop.permute.xlu1 %998 }
 0x3bc   : > { %v1001_v26 = vadd.f32 %v999_v22, %v988_v24 }
 0x3bd   : > { %v2094_v18 = vpop.eup %2093 }
 0x3be   : > { %v780_v23 = vsel %vm727_vm4, %v2094_v18, 0.0  ;;  %v1019_v30 = vpack.c.bf16 %v1001_v26, %v1001_v26 }
 0x3bf   : > { %781 = vadd.xlane.f32.xlu1 %v780_v23  ;;  %874 = vrot.lane.b32.xlu0 %v871_v20, %s2176_s16  ;;  %v1134_v32 = vpop.permute.xlu1 %1133 }
 0x3c0   : > { %v1136_v33 = vmul.f32 %v1134_v32, %v2369_v9 }
 0x3c3   : > { %1025 = vrot.lane.b32.xlu0 %v1020_v25, %s2177_s19 }
 0x3c7   : > { %1022 = vrot.lane.b32.xlu0 %v1019_v30, %s2178_s29 }
 0x3cb   : > { %1173 = vrot.lane.b32.xlu0 %v1168_v31, %s2179_s26 }
 0x425   : > { %v1147_v34 = vpop.permute.xlu0 %1146 }
 0x426   : > { %v1149_v35 = vadd.f32 %v1147_v34, %v1136_v33 }
 0x428   : > { %v1167_v36 = vpack.c.bf16 %v1149_v35, %v1149_v35 }
 0x429   : > { %v789_v37 = vpop.permute.xlu0 %788 }
 0x42a   : > { %v795_v38 = vsel %vm793_vm5, %v789_v37, 0  ;;  %1170 = vrot.lane.b32.xlu0 %v1167_v36, %s2180_s1 }
 0x42b   : > { %1926 = vmatpush3.bf16.msra.mxu1 %v795_v38 }
 0x42c   : > { %1931 = vmatprep.subr.bf16.mxu1 %v2155_v2 }
 0x42d   : > { %v878_v40 = vpop.permute.xlu0 %877 }
 0x42e   : > { %v883_v9 = vsel %vm727_vm4, %v878_v40, 0 }
 0x431   : > { %v875_v42 = vpop.permute.xlu0 %874 }
 0x435   : > { %v1026_v45 = vpop.permute.xlu0 %1025 }
 0x436   : > { %v1031_v47 = vsel %vm727_vm4, %v1026_v45, 0 }
 0x439   : > { %v1023_v46 = vpop.permute.xlu0 %1022 }
 0x43d   : > { %v1174_v48 = vpop.permute.xlu0 %1173 }
 0x43e   : > { %v1179_v49 = vsel %vm727_vm4, %v1174_v48, 0 }
 0x448   : > { %v782_v39 = vpop.xlane.xlu1 %781 }
 0x449   : > { %2095 = vrcp.f32 %v782_v39 }
 0x456   : > { %v2096_v41 = vpop.eup %2095 }
 0x457   : > { %v784_v43 = vmul.f32 %v2096_v41, %v2094_v18 }
 0x459   : > { %v785_v44 = vpack.c.bf16 %v784_v43, %v784_v43  ;;  %v2080_v43 = vld [vmem:[%s2307_s0] sm:$0xff]  }
 0x45b   : > { %1928 = vmatmul.mubr.msk.bf16.vlgmr.msra.gmra.mxu1 %vm727_vm4, %v785_v44 }
 0x45c   : > { %1932 = vmatpush3.bf16.xpose.msra.mxu1 %v883_v9  ;;  %1933 = vmatprep.mubr.msk.bf16.mxu1 %vm2156_vm1, %v2155_v2 }
 0x45d   : > { %1943 = vmatprep.subr.bf16.mxu1 %v2155_v2 }
 0x463   : > { %1934 = vmatmul.mubr.msk.bf16.vlgmr.msra.gmra.mxu1 %vm727_vm4, %v875_v42  ;;  %v2079_v42 = vld [vmem:[%s2307_s0 + $0x8] sm:$0xff]  }
 0x464   : > { %1944 = vmatpush3.bf16.xpose.msra.mxu1 %v1031_v47  ;;  %1945 = vmatprep.mubr.msk.bf16.mxu1 %vm2156_vm1, %v2155_v2 }
 0x465   : > { %1955 = vmatprep.subr.bf16.mxu1 %v2155_v2 }
 0x46b   : > { %1946 = vmatmul.mubr.msk.bf16.vlgmr.msra.gmra.mxu1 %vm727_vm4, %v1023_v46 }
 0x46c   : > { %1956 = vmatpush3.bf16.xpose.msra.mxu1 %v1179_v49  ;;  %1957 = vmatprep.mubr.msk.bf16.mxu1 %vm2156_vm1, %v2155_v2 }
 0x46d   : > { %1967 = vmatprep.subr.bf16.mxu1 %v2155_v2 }
 0x49c   : > { %v1171_v50 = vpop.permute.xlu0 %1170 }
 0x49d   : > { %1958 = vmatmul.mubr.msk.bf16.vlgmr.msra.gmra.mxu1 %vm727_vm4, %v1171_v50 }
 0x49e   : > { %1971 = vmatprep.mubr.msk.bf16.mxu1 %vm2156_vm1, %v2155_v2  ;;  %1968 = vmatpush3.bf16.msra.mxu1 %v2079_v42 }
 0x49f   : > { %1969 = vmatprep.subr.bf16.mxu1 %v2155_v2 }
 0x4a2   : > { %1970 = vmatpush3.bf16.msra.mxu1 %v2080_v43 }
 0x4a3   : > { %1983 = vmatprep.subr.bf16.mxu1 %v2155_v2 }
 0x51b   : > { %v2466_v51 = vpop.f32.mrf.mxu1 }
 0x51d   : > { %v1929_v52 = vpop.f32.mrf.mxu1 }
 0x51e   : > { %v1366_v52 = vmul.f32 %v2350_v4, %v2350_v4 }
 0x51f   : > { %v834_v53 = vpop.f32.mrf.mxu1 }
 0x520   : > { %v1367_v53 = vsel %vm646_vm2, %v1366_v52, 0.0 }
 0x521   : > { %v1930_v54 = vpop.f32.mrf.mxu1 }
 0x523   : > { %v919_v55 = vpop.f32.mrf.mxu1 }
 0x524   : > { %v925_v56 = vsel %vm727_vm4, %v919_v55, -inf }
 0x525   : > { %926 = vmax.xlane.f32.xlu0 %v925_v56  ;;  %v1935_v57 = vpop.f32.mrf.mxu1 }
 0x527   : > { %v922_v58 = vpop.f32.mrf.mxu1 }
 0x528   : > { %v2081_v58 = vld [vmem:[%s2320_s22 + $0x8] sm:$0xff]  }
 0x529   : > { %v1936_v59 = vpop.f32.mrf.mxu1 }
 0x52b   : > { %v1067_v60 = vpop.f32.mrf.mxu1 }
 0x52c   : > { %v1073_v61 = vsel %vm727_vm4, %v1067_v60, -inf }
 0x52d   : > { %1074 = vmax.xlane.f32.xlu1 %v1073_v61  ;;  %v1947_v62 = vpop.f32.mrf.mxu1 }
 0x52f   : > { %v1070_v63 = vpop.f32.mrf.mxu1 }
 0x531   : > { %v1948_v0 = vpop.f32.mrf.mxu1 }
 0x53b   : > { %1085 = vrot.lane.b32.xlu0 %v2437_v11, %s2170_s17 }
 0x55d   : > { %v1215_v1 = vpop.f32.mrf.mxu1 }
 0x55e   : > { %v1221_v3 = vsel %vm727_vm4, %v1215_v1, -inf }
 0x55f   : > { %1222 = vmax.xlane.f32.xlu1 %v1221_v3  ;;  %v1959_v6 = vpop.f32.mrf.mxu1  ;;  %v2082_v3 = vld [vmem:[%s2325_s30 + $0x8] sm:$0xff]  }
 0x560   : > { %v2083_v6 = vld [vmem:[%s2320_s22] sm:$0xff]  }
 0x561   : > { %v1218_v7 = vpop.f32.mrf.mxu1 }
 0x562   : > { %v2084_v7 = vld [vmem:[%s2325_s30] sm:$0xff]   ;;  %s2606_s30 = scalar_lea.vmem %s2576_s6, %s2280_s28 }
 0x563   : > { %v1960_v8 = vpop.f32.mrf.mxu1 }
 0x570   : > { %937 = vrot.lane.b32.xlu1 %v2437_v11, %s2171_s20 }
 0x5ae   : > { %v927_v10 = vpop.xlane.xlu0 %926 }
 0x5af   : > { %v928_v5 = vsub.f32 %v919_v55, %v927_v10 }
 0x5b1   : > { %v929_v12 = vmul.f32 1.442695, %v928_v5 }
 0x5b2   : > { %v1086_v31 = vpop.permute.xlu0 %1085 }
 0x5b3   : > { %2097 = vpow2.f32 %v929_v12  ;;  %v1091_v33 = vsel %vm793_vm5, %v1086_v31, 0  ;;  %v2092_v31 = vld [vmem:[%s2331_s15] sm:$0xff]  }
 0x5b6   : > { %v1075_v13 = vpop.xlane.xlu1 %1074 }
 0x5b7   : > { %v1076_v14 = vsub.f32 %v1067_v60, %v1075_v13  ;;  %v1851_v13 = vld [vmem:[%s2605_s24] ss:$0 sm:$0xff] }
 0x5b9   : > { %v1077_v16 = vmul.f32 1.442695, %v1076_v14  ;;  %v1847_v14 = vld [vmem:[%s2606_s30] ss:$0 sm:$0xff] }
 0x5bb   : > { %2099 = vpow2.f32 %v1077_v16 }
 0x5c0   : > { %v2098_v15 = vpop.eup %2097 }
 0x5c1   : > { %v931_v17 = vsel %vm727_vm4, %v2098_v15, 0.0 }
 0x5c2   : > { %932 = vadd.xlane.f32.xlu1 %v931_v17 }
 0x5c8   : > { %v2100_v18 = vpop.eup %2099 }
 0x5c9   : > { %v1079_v19 = vsel %vm727_vm4, %v2100_v18, 0.0 }
 0x5ca   : > { %1080 = vadd.xlane.f32.xlu1 %v1079_v19 }
 0x5e8   : > { %v1223_v20 = vpop.xlane.xlu1 %1222 }
 0x5e9   : > { %v1224_v21 = vsub.f32 %v1215_v1, %v1223_v20 }
 0x5eb   : > { %v1225_v22 = vmul.f32 1.442695, %v1224_v21 }
 0x5ec   : > { %v938_v23 = vpop.permute.xlu1 %937 }
 0x5ed   : > { %2101 = vpow2.f32 %v1225_v22  ;;  %v943_v24 = vsel %vm793_vm5, %v938_v23, 0 }
 0x5ee   : > { %1938 = vmatpush3.bf16.msra.mxu0 %v943_v24  ;;  %v2085_v24 = vld [vmem:[%s2331_s15 + $0x38] sm:$0xff]  }
 0x5ef   : > { %1949 = vmatprep.subr.bf16.mxu0 %v2155_v2 }
 0x5fa   : > { %v2102_v25 = vpop.eup %2101 }
 0x5fb   : > { %v1227_v26 = vsel %vm727_vm4, %v2102_v25, 0.0 }
 0x5fc   : > { %1228 = vadd.xlane.f32.xlu1 %v1227_v26  ;;  %v2087_v26 = vld [vmem:[%s2331_s15 + $0x28] sm:$0xff]  }
 0x60d   : > { %1233 = vrot.lane.b32.xlu1 %v2437_v11, %s2168_s27 }
 0x64b   : > { %v933_v27 = vpop.xlane.xlu1 %932 }
 0x64c   : > { %2103 = vrcp.f32 %v933_v27  ;;  %v2088_v27 = vld [vmem:[%s2331_s15 + $0x20] sm:$0xff]  }
 0x653   : > { %v1081_v28 = vpop.xlane.xlu1 %1080 }
 0x654   : > { %2105 = vrcp.f32 %v1081_v28  ;;  %v2089_v28 = vld [vmem:[%s2331_s15 + $0x18] sm:$0xff]  }
 0x659   : > { %v2104_v29 = vpop.eup %2103 }
 0x65a   : > { %v935_v30 = vmul.f32 %v2104_v29, %v2098_v15  ;;  %v2090_v29 = vld [vmem:[%s2331_s15 + $0x10] sm:$0xff]  }
 0x65c   : > { %v936_v32 = vpack.c.bf16 %v935_v30, %v935_v30  ;;  %v2091_v30 = vld [vmem:[%s2331_s15 + $0x8] sm:$0xff]  }
 0x65e   : > { %1940 = vmatmul.mubr.msk.bf16.vlgmr.msra.gmra.mxu0 %vm727_vm4, %v936_v32 }
 0x65f   : > { %1950 = vmatpush3.bf16.msra.mxu0 %v1091_v33  ;;  %1951 = vmatprep.mubr.msk.bf16.mxu0 %vm2156_vm1, %v2155_v2 }
 0x660   : > { %1961 = vmatprep.subr.bf16.mxu0 %v2155_v2 }
 0x661   : > { %v2106_v34 = vpop.eup %2105 }
 0x662   : > { %v1083_v11 = vmul.f32 %v2106_v34, %v2100_v18 }
 0x664   : > { %v1084_v35 = vpack.c.bf16 %v1083_v11, %v1083_v11 }
 0x666   : > { %1952 = vmatmul.mubr.msk.bf16.vlgmr.msra.gmra.mxu0 %vm727_vm4, %v1084_v35 }
 0x667   : > { %1963 = vmatprep.mubr.msk.bf16.mxu0 %vm2156_vm1, %v2155_v2 }
 0x685   : > { %v1229_v36 = vpop.xlane.xlu1 %1228 }
 0x686   : > { %2107 = vrcp.f32 %v1229_v36 }
 0x689   : > { %v1234_v37 = vpop.permute.xlu1 %1233 }
 0x68a   : > { %v1239_v38 = vsel %vm793_vm5, %v1234_v37, 0 }
 0x68b   : > { %1962 = vmatpush3.bf16.msra.mxu0 %v1239_v38 }
 0x68c   : > { %1975 = vmatprep.subr.bf16.mxu0 %v2155_v2 }
 0x693   : > { %v2108_v39 = vpop.eup %2107 }
 0x694   : > { %v1231_v40 = vmul.f32 %v2108_v39, %v2102_v25  ;;  %v2086_v25 = vld [vmem:[%s2331_s15 + $0x30] sm:$0xff]  }
 0x696   : > { %v1232_v41 = vpack.c.bf16 %v1231_v40, %v1231_v40 }
 0x698   : > { %1964 = vmatmul.mubr.msk.bf16.vlgmr.msra.gmra.mxu0 %vm727_vm4, %v1232_v41 }
 0x699   : > { %1979 = vmatprep.mubr.msk.bf16.mxu0 %vm2156_vm1, %v2155_v2  ;;  %1976 = vmatpush3.bf16.msra.mxu0 %v2081_v58 }
 0x69a   : > { %1977 = vmatprep.subr.bf16.mxu0 %v2155_v2 }
 0x69d   : > { %1978 = vmatpush3.bf16.msra.mxu0 %v2083_v6 }
 0x69e   : > { %1991 = vmatprep.subr.bf16.mxu0 %v2155_v2 }
 0x71e   : > { %v979_v44 = vpop.f32.mrf.mxu0 }
 0x71f   : > { %1282 = vrot.lane.b32.xlu1 %v979_v44, %s2169_s14 }
 0x720   : > { %v1941_v9 = vpop.f32.mrf.mxu0 }
 0x722   : > { %v982_v45 = vpop.f32.mrf.mxu0 }
 0x724   : > { %v1942_v46 = vpop.f32.mrf.mxu0 }
 0x726   : > { %v1127_v47 = vpop.f32.mrf.mxu0 }
 0x727   : > { %1286 = vrot.lane.b32.xlu1 %v1127_v47, %s2172_s23 }
 0x728   : > { %v1953_v48 = vpop.f32.mrf.mxu0 }
 0x72a   : > { %v1130_v49 = vpop.f32.mrf.mxu0 }
 0x72c   : > { %v1954_v50 = vpop.f32.mrf.mxu0 }
 0x74b   : > { %1368 = vadd.xlane.f32.xlu1 %v1367_v53 }
 0x758   : > { %v1275_v54 = vpop.f32.mrf.mxu0 }
 0x759   : > { %1290 = vrot.lane.b32.xlu0 %v1275_v54, %s2173_s25  ;;  %v1858_v54 = vld [vmem:[%s606_s18] ss:$0 sm:$0xff] }
 0x75a   : > { %v1965_v55 = vpop.f32.mrf.mxu0 }
 0x75c   : > { %v1278_v56 = vpop.f32.mrf.mxu0 }
 0x75e   : > { %v1966_v57 = vpop.f32.mrf.mxu0 }
 0x791   : > { %v1283_v59 = vpop.permute.xlu1 %1282 }
 0x792   : > { %v1293_v61 = vsel %vm727_vm4, %v2466_v51, %v1283_v59 }
 0x799   : > { %v1287_v60 = vpop.permute.xlu1 %1286 }
 0x79a   : > { %v1295_v62 = vsel %vm1294_vm6, %v1293_v61, %v1287_v60 }
 0x7cb   : > { %v1291_v63 = vpop.permute.xlu0 %1290 }
 0x7cc   : > { %v1297_v0 = vsel %vm1296_vm7, %v1295_v62, %v1291_v63 }
 0x7cd   : > { %v1298_v1 = vpack.c.bf16 %v1297_v0, %v1297_v0 }
 0x7cf   : > { %1972 = vmatmul.mubr.msk.bf16.vlgmr.msra.gmra.mxu1 %vm646_vm2, %v1298_v1 }
 0x7d0   : > { %1987 = vmatprep.mubr.msk.bf16.mxu1 %vm2156_vm1, %v2155_v2  ;;  %1984 = vmatpush3.bf16.msra.mxu1 %v2082_v3 }
 0x7d1   : > { %1985 = vmatprep.subr.bf16.mxu1 %v2155_v2 }
 0x7d4   : > { %1986 = vmatpush3.bf16.msra.mxu1 %v2084_v7  ;;  %v1369_v51 = vpop.xlane.xlu1 %1368 }
 0x7d5   : > { %v1371_v8 = vmul.f32 0.03125, %v1369_v51 }
 0x7d7   : > { %v1372_v10 = vadd.f32 1e-05, %v1371_v8 }
 0x7d9   : > { %2109 = vrsqrt.f32 %v1372_v10 }
 0x7e6   : > { %v2110_v5 = vpop.eup %2109 }
 0x7e7   : > { %v1374_v12 = vmul.f32 %v2110_v5, %v2350_v4 }
 0x7e9   : > { %v1381_v16 = vmul.f32 %v1851_v13, %v1374_v12 }
 0x88f   : > { %v1359_v15 = vpop.f32.mrf.mxu1 }
 0x890   : > { %v1360_v17 = vadd.f32 %v1847_v14, %v1359_v15 }
 0x891   : > { %v1973_v18 = vpop.f32.mrf.mxu1 }
 0x892   : > { %v1382_v19 = vadd.f32 %v1381_v16, %v1360_v17 }
 0x893   : > { %v1362_v20 = vpop.f32.mrf.mxu1 }
 0x894   : > { %v1383_v4 = vpack.c.bf16 %v1382_v19, %v1382_v19  ;;  %v1527_v21 = vmul.f32 %v1382_v19, %v1382_v19 }
 0x895   : > { %v1974_v22 = vpop.f32.mrf.mxu1 }
 0x896   : > { %1980 = vmatmul.mubr.msk.bf16.vlgmr.msra.gmra.mxu0 %vm646_vm2, %v1383_v4  ;;  %1988 = vmatmul.mubr.msk.bf16.vlgmr.msra.gmra.mxu1 %vm646_vm2, %v1383_v4  ;;  %v1528_v23 = vsel %vm646_vm2, %v1527_v21, 0.0 }
 0x897   : > { %1529 = vadd.xlane.f32.xlu0 %v1528_v23  ;;  %2007 = vmatprep.mubr.msk.bf16.mxu0 %vm2156_vm1, %v2155_v2 }
 0x898   : > { %1992 = vmatpush3.bf16.msra.mxu0 %v2085_v24 }
 0x899   : > { %1993 = vmatprep.subr.bf16.mxu0 %v2155_v2 }
 0x89c   : > { %1994 = vmatpush3.bf16.msra.mxu0 %v2086_v25 }
 0x89d   : > { %1995 = vmatprep.subr.bf16.mxu0 %v2155_v2 }
 0x8a0   : > { %1996 = vmatpush3.bf16.msra.mxu0 %v2087_v26 }
 0x8a1   : > { %1997 = vmatprep.subr.bf16.mxu0 %v2155_v2 }
 0x8a4   : > { %1998 = vmatpush3.bf16.msra.mxu0 %v2088_v27 }
 0x8a5   : > { %1999 = vmatprep.subr.bf16.mxu0 %v2155_v2 }
 0x8a8   : > { %2000 = vmatpush3.bf16.msra.mxu0 %v2089_v28 }
 0x8a9   : > { %2001 = vmatprep.subr.bf16.mxu0 %v2155_v2 }
 0x8ac   : > { %2002 = vmatpush3.bf16.msra.mxu0 %v2090_v29 }
 0x8ad   : > { %2003 = vmatprep.subr.bf16.mxu0 %v2155_v2 }
 0x8b0   : > { %2004 = vmatpush3.bf16.msra.mxu0 %v2091_v30 }
 0x8b1   : > { %2005 = vmatprep.subr.bf16.mxu0 %v2155_v2 }
 0x8b4   : > { %2006 = vmatpush3.bf16.msra.mxu0 %v2092_v31 }
 0x920   : > { %v1530_v48 = vpop.xlane.xlu0 %1529 }
 0x921   : > { %v1531_v49 = vmul.f32 0.03125, %v1530_v48 }
 0x923   : > { %v1532_v50 = vadd.f32 1e-05, %v1531_v49 }
 0x956   : > { %v1437_v32 = vpop.f32.mrf.mxu0  ;;  %v1502_v33 = vpop.f32.mrf.mxu1 }
 0x957   : > { %v1444_v34 = vmul.f32 0.044715, %v1437_v32  ;;  %v1443_v9 = vmul.f32 0.5, %v1437_v32 }
 0x958   : > { %v1981_v11 = vpop.f32.mrf.mxu0  ;;  %v1989_v35 = vpop.f32.mrf.mxu1 }
 0x959   : > { %v1445_v36 = vmul.f32 %v1444_v34, %v1437_v32 }
 0x95a   : > { %v1440_v37 = vpop.f32.mrf.mxu0  ;;  %v1505_v38 = vpop.f32.mrf.mxu1 }
 0x95b   : > { %v1446_v39 = vmul.f32 %v1445_v36, %v1437_v32 }
 0x95c   : > { %v1982_v40 = vpop.f32.mrf.mxu0  ;;  %v1990_v41 = vpop.f32.mrf.mxu1 }
 0x95d   : > { %v1447_v42 = vadd.f32 %v1446_v39, %v1437_v32 }
 0x95f   : > { %v1448_v43 = vmul.f32 0.7978846, %v1447_v42 }
 0x961   : > { %2111 = vtanh.f32 %v1448_v43 }
 0x962   : > { %2113 = vrsqrt.f32 %v1532_v50 }
 0x96e   : > { %v2112_v44 = vpop.eup %2111 }
 0x96f   : > { %v1450_v2 = vadd.f32 1.0, %v2112_v44  ;;  %v2114_v52 = vpop.eup %2113 }
 0x970   : > { %v1534_v53 = vmul.f32 %v2114_v52, %v1382_v19 }
 0x971   : > { %v1451_v45 = vmul.f32 %v1450_v2, %v1443_v9 }
 0x972   : > { %v1541_v55 = vmul.f32 %v1858_v54, %v1534_v53 }
 0x973   : > { %v1508_v46 = vmul.f32 %v1502_v33, %v1451_v45 }
 0x975   : > { %v1509_v47 = vpack.c.bf16 %v1508_v46, %v1508_v46 }
 0x977   : > { %2008 = vmatmul.mubr.bf16.vlgmr.msra.gmra.mxu0 %v1509_v47 }
 0xa37   : > { %v1624_v56 = vpop.f32.mrf.mxu0 }
 0xa38   : > { %v1625_v57 = vadd.f32 %v1624_v56, %v1541_v55 }
 0xa39   : > { %v2009_v58 = vpop.f32.mrf.mxu0 }
 0xa3a   : > { %1630 = vst.msk [vmem:[%s2341_s2] sm:$0xff] %vm646_vm2, %v1625_v57 }
 0xa3b   : > { %v1627_v59 = vpop.f32.mrf.mxu0 }
 0xa3d   : > { %v2010_v60 = vpop.f32.mrf.mxu0 }
 0xa3e PF: > { %s2607_s17 = sld [smem:[#allocation5_spill]] }
 0xa3f   : > { %s2608_s21 = sld [smem:[#allocation3_spill]] }
 0xa40   : > { %s2609_s22 = sld [smem:[#allocation4_spill]] }
 0xa41   : > { %s2610_s23 = sld [smem:[#allocation6_spill]] }
 0xa42   : > { %s2611_s24 = sld [smem:[#allocation7_spill]] }
 0xa44   : > { %s22_s25 = sadd.s32 1, %s2607_s17  }
 0xa45   : > { %p19_p8 = scmp.ge.s32.totalorder %s22_s25, 6  }
 0xa47   :  { %21 = sbr.rel (!%p19_p8) target bundleno = 5 (0x5), region = 135 }

</bundles_post_ra>
